<compile_context>
chip_gen: v5e
topology: v5e:2x2
jax: 0.10.0
libtpu: 0.0.40
codegen_flags: <defaults>
</compile_context>

<pallas_src>
import jax
import jax.numpy as jnp
from jax.experimental import pallas as pl
from jax.experimental.pallas import tpu as pltpu

N_EMBD = 192
HIDDEN = 4 * N_EMBD  # 768


# ----------------------------- helpers --------------------------------------

def _round_up(x, m):
    return -(-x // m) * m


def _device_kind():
    try:
        return jax.devices()[0].device_kind.lower()
    except Exception:
        return ""


def _num_tensorcores():
    """v7x has 2 TensorCores sharing 'parallel' grid axes; v5e/v6e have 1."""
    return 2 if "v7" in _device_kind() else 1


def _has_bf16_vpu():
    """v6e/v7x VALUs are bf16-native; v4/v5 are not (keep hidden ops in f32 there)."""
    kind = _device_kind()
    return not ("v4" in kind or "v5" in kind)


def _choose_tiling(M, n_cores, tm_max=2048):
    """Row tile (multiple of 8) and tile count.

    Single-TC chips: one big tile up to tm_max (no pointless grid-step overhead).
    Multi-TC chips: tile count rounded to a multiple of n_cores so all cores
    get equal work, but only when M is large enough to be worth splitting.
    """
    M8 = _round_up(max(M, 1), 8)
    tm = min(tm_max, M8)
    n_tiles = -(-M8 // tm)
    if n_cores > 1 and M8 > 8 * n_cores and n_tiles % n_cores:
        n_tiles = _round_up(n_tiles, n_cores)
        tm = _round_up(-(-M8 // n_tiles), 8)
        n_tiles = -(-M8 // tm)
        if n_tiles % n_cores:
            n_tiles = _round_up(n_tiles, n_cores)
    return tm, n_tiles


def _vmem_limit_bytes(tm, C, H, C_out, in_itemsize, out_itemsize):
    """Size the VMEM request from the actual per-step footprint (with headroom),
    capped well under physical VMEM (64 MiB on v7x, 128 MiB on v5e/v6e)."""
    x_tile = 2 * tm * C * in_itemsize          # double-buffered input rows
    o_tile = 2 * tm * C_out * out_itemsize     # double-buffered output rows
    weights = 2 * (C * H + H * C_out) * in_itemsize   # worst case: double buffered
    biases = 2 * (H + C_out) * 4
    hidden = tm * H * 4                        # f32 accumulator of first matmul
    need = x_tile + o_tile + weights + biases + hidden
    limit = int(need * 1.5) + (8 << 20)        # headroom for Mosaic scratch/spills
    cap = 48 << 20                             # safe default (v7x has 64 MiB VMEM)
    try:
        cap = min(96 << 20, (int(pltpu.get_tpu_info().vmem_capacity_bytes) * 3) // 4)
    except Exception:
        pass
    return max(16 << 20, min(limit, cap))


# ----------------------------- kernel ---------------------------------------

def _ffwd_kernel(x_ref, w1_ref, b1_ref, w2_ref, b2_ref, o_ref):
    # x_ref: (tm, C); w1_ref: (C, H); b1_ref: (1, H); w2_ref: (H, C_out); b2_ref: (1, C_out)
    x = x_ref[...]
    # First matmul on the MXU, f32 accumulation.
    acc = jnp.dot(x, w1_ref[...], preferred_element_type=jnp.float32)
    # Bias-add + ReLU in b1's dtype: bf16 on v6e/v7x (halves VPU work and the
    # (tm, 4C) intermediate footprint), f32 on v4/v5 and on the f32 path.
    h = jnp.maximum(acc.astype(b1_ref.dtype) + b1_ref[...], 0)
    # Second matmul (operands in the weight dtype), f32 accumulation, f32 bias.
    h = h.astype(w2_ref.dtype)
    y = jnp.dot(h, w2_ref[...], preferred_element_type=jnp.float32) + b2_ref[...]
    o_ref[...] = y.astype(o_ref.dtype)


# ----------------------------- wrapper --------------------------------------

def feedforward(x, w1, b1, w2, b2, *, tm=None, compute_dtype=None, out_dtype=None):
    """x: (B, T, C). Returns (B, T, C) in `out_dtype` (default: x.dtype).

    compute_dtype: MXU operand dtype (default bf16; accumulation stays f32).
    Pass jnp.float32 for an exact match to the PyTorch eval-mode forward.
    """
    B, T, C = x.shape
    C_in, H = w1.shape
    assert C_in == C and w2.shape == (H, C) and b1.shape[-1] == H and b2.shape[-1] == C
    M = B * T
    out_dtype = jnp.dtype(out_dtype or x.dtype)
    compute_dtype = jnp.dtype(compute_dtype or jnp.bfloat16)
    bf16_compute = compute_dtype == jnp.dtype(jnp.bfloat16)

    # ---- tiling (generation-aware) ----
    n_cores = _num_tensorcores()
    if tm is None:
        tm, n_tiles = _choose_tiling(M, n_cores)
    else:
        tm = _round_up(max(int(tm), 8), 8)
        n_tiles = -(-M // tm)
    M_pad = n_tiles * tm

    # ---- lane-dense output: pad W2/b2 output columns to a multiple of 128 ----
    C_out = _round_up(C, 128)   # 192 -> 256; extra columns are sliced off below

    # NOTE: the casts / pads below are cheap XLA ops; in a full model you would
    # pre-cast/pre-pad the weights once instead of per call.
    x2 = x.reshape(M, C)
    if M_pad != M:
        x2 = jnp.pad(x2, ((0, M_pad - M), (0, 0)))
    x2 = x2.astype(compute_dtype)
    w1c = w1.astype(compute_dtype)
    w2c = w2.astype(compute_dtype)
    if C_out != C:
        w2c = jnp.pad(w2c, ((0, 0), (0, C_out - C)))

    hidden_dtype = compute_dtype if (bf16_compute and _has_bf16_vpu()) else jnp.float32
    b1_2 = b1.reshape(1, H).astype(hidden_dtype)
    b2_2 = b2.reshape(1, C).astype(jnp.float32)
    if C_out != C:
        b2_2 = jnp.pad(b2_2, ((0, 0), (0, C_out - C)))

    vmem_limit = _vmem_limit_bytes(tm, C, H, C_out,
                                   compute_dtype.itemsize, out_dtype.itemsize)

    def _call(buffered_residents):
        resident = {}
        if buffered_residents:
            # Weights/biases use constant index maps (no re-DMA); single-buffer
            # them to save VMEM headroom.
            resident = dict(pipeline_mode=pl.Buffered(1))
        return pl.pallas_call(
            _ffwd_kernel,
            out_shape=jax.ShapeDtypeStruct((M_pad, C_out), out_dtype),
            grid=(n_tiles,),
            in_specs=[
                pl.BlockSpec((tm, C), lambda i: (i, 0)),                # x rows (pipelined)
                pl.BlockSpec((C, H), lambda i: (0, 0), **resident),     # W1 (resident)
                pl.BlockSpec((1, H), lambda i: (0, 0), **resident),     # b1 (resident)
                pl.BlockSpec((H, C_out), lambda i: (0, 0), **resident), # W2 (resident, lane-padded)
                pl.BlockSpec((1, C_out), lambda i: (0, 0), **resident), # b2 (resident, lane-padded)
            ],
            out_specs=pl.BlockSpec((tm, C_out), lambda i: (i, 0)),
            compiler_params=pltpu.CompilerParams(
                dimension_semantics=("parallel",),
                vmem_limit_bytes=vmem_limit,
            ),
        )(x2, w1c, b1_2, w2c, b2_2)

    try:
        out = _call(True)
    except Exception:
        # pipeline_mode=pl.Buffered(1) unsupported on this jax version:
        # fall back to default double-buffered residents (perf-only difference).
        out = _call(False)

    return out[:M, :C].reshape(B, T, C)


def init_params(key, n_embd=N_EMBD):
    """Deterministic PyTorch-style init: U(-1/sqrt(fan_in), 1/sqrt(fan_in))."""
    hidden = 4 * n_embd
    k1, k2, k3, k4 = jax.random.split(key, 4)
    bound1 = 1.0 / (n_embd ** 0.5)
    bound2 = 1.0 / (hidden ** 0.5)
    w1 = jax.random.uniform(k1, (n_embd, hidden), jnp.float32, -bound1, bound1)
    b1 = jax.random.uniform(k2, (hidden,), jnp.float32, -bound1, bound1)
    w2 = jax.random.uniform(k3, (hidden, n_embd), jnp.float32, -bound2, bound2)
    b2 = jax.random.uniform(k4, (n_embd,), jnp.float32, -bound2, bound2)
    return w1, b1, w2, b2


if __name__ == "__main__":
    key = jax.random.PRNGKey(0)
    kx, kp = jax.random.split(key)

    B, T, C = 2, 8, N_EMBD
    x = jax.random.normal(kx, (B, T, C), jnp.float32)
    w1, b1, w2, b2 = init_params(kp, C)

    def torch_ref(xa):
        m = xa.shape[0] * xa.shape[1]
        h = jnp.maximum(xa.reshape(m, C) @ w1 + b1, 0.0)
        return (h @ w2 + b2).reshape(xa.shape)

    # --- 1) f32 MXU operands: exact match to the PyTorch eval-mode forward ---
    y32 = jax.block_until_ready(
        feedforward(x, w1, b1, w2, b2, compute_dtype=jnp.float32))
    assert y32.shape == (B, T, C) and y32.dtype == x.dtype
    assert jnp.allclose(y32, torch_ref(x), atol=2e-4, rtol=2e-4), "f32 mismatch vs reference"

    # --- 2) default path: bf16 MXU operands, f32 accumulation, f32 output ---
    y_bf = jax.block_until_ready(feedforward(x, w1, b1, w2, b2))
    assert y_bf.shape == (B, T, C)
    assert jnp.allclose(y_bf, torch_ref(x), atol=5e-2, rtol=5e-2), "bf16 mismatch vs reference"

    # --- 3) uneven / larger M: row padding, lane-padded output, bf16 output ---
    B2, T2 = 3, 37   # M = 111, not a multiple of 8 or of the chosen tile
    x2 = jax.random.normal(kx, (B2, T2, C), jnp.float32)
    y2 = jax.block_until_ready(
        feedforward(x2, w1, b1, w2, b2, out_dtype=jnp.bfloat16))
    assert y2.shape == (B2, T2, C) and y2.dtype == jnp.bfloat16
    assert jnp.allclose(y2.astype(jnp.float32), torch_ref(x2), atol=6e-2, rtol=6e-2), \
        "padded-M / bf16-out mismatch vs reference"

    print("KERNEL_OK")
</pallas_src>

<mosaic_0001>
module attributes {stable_mosaic.version = 11 : i64} {
  func.func @_ffwd_kernel(%arg0: i32, %arg1: memref<16x192xf32, #tpu.memory_space<vmem>>, %arg2: memref<192x768xf32, #tpu.memory_space<vmem>>, %arg3: memref<1x768xf32, #tpu.memory_space<vmem>>, %arg4: memref<768x256xf32, #tpu.memory_space<vmem>>, %arg5: memref<1x256xf32, #tpu.memory_space<vmem>>, %arg6: memref<16x256xf32, #tpu.memory_space<vmem>>) attributes {dimension_semantics = [#tpu.dimension_semantics<parallel>], iteration_bounds = array<i64: 1>, scalar_prefetch = 0 : i64, scratch_operands = 0 : i64, tpu.core_type = #tpu.core_type<tc>, window_params = [{transform_indices = @transform_0, window_bounds = array<i64: 16, 192>}, {pipeline_mode = #tpu.pipeline_mode<synchronous>, transform_indices = @transform_1, window_bounds = array<i64: 192, 768>}, {pipeline_mode = #tpu.pipeline_mode<synchronous>, transform_indices = @transform_2, window_bounds = array<i64: 1, 768>}, {pipeline_mode = #tpu.pipeline_mode<synchronous>, transform_indices = @transform_3, window_bounds = array<i64: 768, 256>}, {pipeline_mode = #tpu.pipeline_mode<synchronous>, transform_indices = @transform_4, window_bounds = array<i64: 1, 256>}, {transform_indices = @transform_5, window_bounds = array<i64: 16, 256>}]} {
    %c0 = arith.constant 0 : index
    %c0_0 = arith.constant 0 : index
    %0 = vector.load %arg1[%c0, %c0_0] : memref<16x192xf32, #tpu.memory_space<vmem>>, vector<16x192xf32>
    %c0_1 = arith.constant 0 : index
    %c0_2 = arith.constant 0 : index
    %1 = vector.load %arg2[%c0_1, %c0_2] : memref<192x768xf32, #tpu.memory_space<vmem>>, vector<192x768xf32>
    %cst = arith.constant dense<0.000000e+00> : vector<16x768xf32>
    %2 = tpu.matmul %0, %1, %cst {dimension_numbers = #tpu.dot_dimension_numbers<[1], [0], [0], [1], [0, 0, 1, 1], [], []>} : vector<16x192xf32>, vector<192x768xf32>, vector<16x768xf32> -> vector<16x768xf32>
    %c0_3 = arith.constant 0 : index
    %c0_4 = arith.constant 0 : index
    %3 = vector.load %arg3[%c0_3, %c0_4] : memref<1x768xf32, #tpu.memory_space<vmem>>, vector<1x768xf32>
    %4 = vector.broadcast %3 : vector<1x768xf32> to vector<16x768xf32>
    %5 = arith.addf %2, %4 : vector<16x768xf32>
    %cst_5 = arith.constant 0.000000e+00 : f32
    %6 = vector.broadcast %cst_5 : f32 to vector<16x768xf32>
    %7 = arith.maximumf %5, %6 : vector<16x768xf32>
    %c0_6 = arith.constant 0 : index
    %c0_7 = arith.constant 0 : index
    %8 = vector.load %arg4[%c0_6, %c0_7] : memref<768x256xf32, #tpu.memory_space<vmem>>, vector<768x256xf32>
    %cst_8 = arith.constant dense<0.000000e+00> : vector<16x256xf32>
    %9 = tpu.matmul %7, %8, %cst_8 {dimension_numbers = #tpu.dot_dimension_numbers<[1], [0], [0], [1], [0, 0, 1, 1], [], []>} : vector<16x768xf32>, vector<768x256xf32>, vector<16x256xf32> -> vector<16x256xf32>
    %c0_9 = arith.constant 0 : index
    %c0_10 = arith.constant 0 : index
    %10 = vector.load %arg5[%c0_9, %c0_10] : memref<1x256xf32, #tpu.memory_space<vmem>>, vector<1x256xf32>
    %11 = vector.broadcast %10 : vector<1x256xf32> to vector<16x256xf32>
    %12 = arith.addf %9, %11 : vector<16x256xf32>
    %c0_11 = arith.constant 0 : index
    %c0_12 = arith.constant 0 : index
    %13 = vector.load %arg6[%c0_11, %c0_12] : memref<16x256xf32, #tpu.memory_space<vmem>>, vector<16x256xf32>
    tpu.vector_store %arg6[%c0_11, %c0_12], %12 {strides = array<i32>} : memref<16x256xf32, #tpu.memory_space<vmem>>, vector<16x256xf32>,
    return
  }
  func.func @transform_0(%arg0: i32) -> (i32, i32) {
    %c0_i32 = arith.constant 0 : i32
    %c0_i32_0 = arith.constant 0 : i32
    return %arg0, %c0_i32 : i32, i32
  }
  func.func @transform_1(%arg0: i32) -> (i32, i32) {
    %c0_i32 = arith.constant 0 : i32
    %c0_i32_0 = arith.constant 0 : i32
    %c0_i32_1 = arith.constant 0 : i32
    return %c0_i32, %c0_i32_0 : i32, i32
  }
  func.func @transform_2(%arg0: i32) -> (i32, i32) {
    %c0_i32 = arith.constant 0 : i32
    %c0_i32_0 = arith.constant 0 : i32
    %c0_i32_1 = arith.constant 0 : i32
    return %c0_i32, %c0_i32_0 : i32, i32
  }
  func.func @transform_3(%arg0: i32) -> (i32, i32) {
    %c0_i32 = arith.constant 0 : i32
    %c0_i32_0 = arith.constant 0 : i32
    %c0_i32_1 = arith.constant 0 : i32
    return %c0_i32, %c0_i32_0 : i32, i32
  }
  func.func @transform_4(%arg0: i32) -> (i32, i32) {
    %c0_i32 = arith.constant 0 : i32
    %c0_i32_0 = arith.constant 0 : i32
    %c0_i32_1 = arith.constant 0 : i32
    return %c0_i32, %c0_i32_0 : i32, i32
  }
  func.func @transform_5(%arg0: i32) -> (i32, i32) {
    %c0_i32 = arith.constant 0 : i32
    %c0_i32_0 = arith.constant 0 : i32
    return %arg0, %c0_i32 : i32, i32
  }
}

module attributes {stable_mosaic.version = 11 : i64} {
  func.func @_ffwd_kernel(%arg0: i32, %arg1: memref<16x192xf32, #tpu.memory_space<vmem>>, %arg2: memref<192x768xf32, #tpu.memory_space<vmem>>, %arg3: memref<1x768xf32, #tpu.memory_space<vmem>>, %arg4: memref<768x256xf32, #tpu.memory_space<vmem>>, %arg5: memref<1x256xf32, #tpu.memory_space<vmem>>, %arg6: memref<16x256xf32, #tpu.memory_space<vmem>>) attributes {dimension_semantics = [#tpu.dimension_semantics<parallel>], iteration_bounds = array<i64: 1>, scalar_prefetch = 0 : i64, scratch_operands = 0 : i64, tpu.core_type = #tpu.core_type<tc>, window_params = [{transform_indices = @transform_0, window_bounds = array<i64: 16, 192>}, {pipeline_mode = #tpu.pipeline_mode<synchronous>, transform_indices = @transform_1, window_bounds = array<i64: 192, 768>}, {pipeline_mode = #tpu.pipeline_mode<synchronous>, transform_indices = @transform_2, window_bounds = array<i64: 1, 768>}, {pipeline_mode = #tpu.pipeline_mode<synchronous>, transform_indices = @transform_3, window_bounds = array<i64: 768, 256>}, {pipeline_mode = #tpu.pipeline_mode<synchronous>, transform_indices = @transform_4, window_bounds = array<i64: 1, 256>}, {transform_indices = @transform_5, window_bounds = array<i64: 16, 256>}]} {
    %c0 = arith.constant 0 : index
    %c0_0 = arith.constant 0 : index
    %0 = vector.load %arg1[%c0, %c0_0] : memref<16x192xf32, #tpu.memory_space<vmem>>, vector<16x192xf32>
    %c0_1 = arith.constant 0 : index
    %c0_2 = arith.constant 0 : index
    %1 = vector.load %arg2[%c0_1, %c0_2] : memref<192x768xf32, #tpu.memory_space<vmem>>, vector<192x768xf32>
    %cst = arith.constant dense<0.000000e+00> : vector<16x768xf32>
    %2 = tpu.matmul %0, %1, %cst {dimension_numbers = #tpu.dot_dimension_numbers<[1], [0], [0], [1], [0, 0, 1, 1], [], []>} : vector<16x192xf32>, vector<192x768xf32>, vector<16x768xf32> -> vector<16x768xf32>
    %c0_3 = arith.constant 0 : index
    %c0_4 = arith.constant 0 : index
    %3 = vector.load %arg3[%c0_3, %c0_4] : memref<1x768xf32, #tpu.memory_space<vmem>>, vector<1x768xf32>
    %4 = vector.broadcast %3 : vector<1x768xf32> to vector<16x768xf32>
    %5 = arith.addf %2, %4 : vector<16x768xf32>
    %cst_5 = arith.constant 0.000000e+00 : f32
    %6 = vector.broadcast %cst_5 : f32 to vector<16x768xf32>
    %7 = arith.maximumf %5, %6 : vector<16x768xf32>
    %c0_6 = arith.constant 0 : index
    %c0_7 = arith.constant 0 : index
    %8 = vector.load %arg4[%c0_6, %c0_7] : memref<768x256xf32, #tpu.memory_space<vmem>>, vector<768x256xf32>
    %cst_8 = arith.constant dense<0.000000e+00> : vector<16x256xf32>
    %9 = tpu.matmul %7, %8, %cst_8 {dimension_numbers = #tpu.dot_dimension_numbers<[1], [0], [0], [1], [0, 0, 1, 1], [], []>} : vector<16x768xf32>, vector<768x256xf32>, vector<16x256xf32> -> vector<16x256xf32>
    %c0_9 = arith.constant 0 : index
    %c0_10 = arith.constant 0 : index
    %10 = vector.load %arg5[%c0_9, %c0_10] : memref<1x256xf32, #tpu.memory_space<vmem>>, vector<1x256xf32>
    %11 = vector.broadcast %10 : vector<1x256xf32> to vector<16x256xf32>
    %12 = arith.addf %9, %11 : vector<16x256xf32>
    %c0_11 = arith.constant 0 : index
    %c0_12 = arith.constant 0 : index
    %13 = vector.load %arg6[%c0_11, %c0_12] : memref<16x256xf32, #tpu.memory_space<vmem>>, vector<16x256xf32>
    tpu.vector_store %arg6[%c0_11, %c0_12], %12 {strides = array<i32>} : memref<16x256xf32, #tpu.memory_space<vmem>>, vector<16x256xf32>,
    return
  }
  func.func @transform_0(%arg0: i32) -> (i32, i32) {
    %c0_i32 = arith.constant 0 : i32
    %c0_i32_0 = arith.constant 0 : i32
    return %arg0, %c0_i32 : i32, i32
  }
  func.func @transform_1(%arg0: i32) -> (i32, i32) {
    %c0_i32 = arith.constant 0 : i32
    %c0_i32_0 = arith.constant 0 : i32
    %c0_i32_1 = arith.constant 0 : i32
    return %c0_i32, %c0_i32_0 : i32, i32
  }
  func.func @transform_2(%arg0: i32) -> (i32, i32) {
    %c0_i32 = arith.constant 0 : i32
    %c0_i32_0 = arith.constant 0 : i32
    %c0_i32_1 = arith.constant 0 : i32
    return %c0_i32, %c0_i32_0 : i32, i32
  }
  func.func @transform_3(%arg0: i32) -> (i32, i32) {
    %c0_i32 = arith.constant 0 : i32
    %c0_i32_0 = arith.constant 0 : i32
    %c0_i32_1 = arith.constant 0 : i32
    return %c0_i32, %c0_i32_0 : i32, i32
  }
  func.func @transform_4(%arg0: i32) -> (i32, i32) {
    %c0_i32 = arith.constant 0 : i32
    %c0_i32_0 = arith.constant 0 : i32
    %c0_i32_1 = arith.constant 0 : i32
    return %c0_i32, %c0_i32_0 : i32, i32
  }
  func.func @transform_5(%arg0: i32) -> (i32, i32) {
    %c0_i32 = arith.constant 0 : i32
    %c0_i32_0 = arith.constant 0 : i32
    return %arg0, %c0_i32 : i32, i32
  }
}

</mosaic_0001>

<bundles_post_ra>
// kernel: tpu_custom_call.1
= control target key start
LH: loop header
LB: loop body
LE: loop exit
PB: predicated region body
PF: predicated region fallthrough
CT: control target
= control target key end

     0   :  { %10 = vsyncpa [#allocation3], 0  ;;  %s1368_s0 = inlined_call_operand.hbm [shape: f32[16,192], index: 0, kind: input, shape index: {}]   ;;  %s1369_s1 = inlined_call_operand.hbm [shape: f32[192,768], index: 1, kind: input, shape index: {}]   ;;  %s1370_s2 = inlined_call_operand.hbm [shape: f32[1,768], index: 2, kind: input, shape index: {}]   ;;  %s1371_s3 = inlined_call_operand.hbm [shape: f32[768,256], index: 3, kind: input, shape index: {}]   ;;  %s1372_s4 = inlined_call_operand.vmem [shape: f32[1,256], index: 4, kind: input, shape index: {}]   ;;  %s1373_s5 = inlined_call_operand.hbm [shape: f32[16,256], index: 5, kind: output, shape index: {}]  }
   0x1   :  { %11 = vsyncpa [#allocation6], 0 }
   0x2   :  { %12 = vsyncpa [#allocation9], 0  ;;  %s31_s20 = sshll.u32 %s1369_s1, 4  ;;  %s32_s20 = int_to_ptr.hbm [resolvable:$true] %s31_s20 }
   0x3   :  { %13 = vsyncpa [#allocation4], 0  ;;  %s1187_s21 = smov [#allocation5]   ;;  %s18_s25 = sshll.u32 %s1368_s0, 4  ;;  %s19_s25 = int_to_ptr.hbm [resolvable:$true] %s18_s25 }
   0x4   :  { %s33_s22 = sshll.u32 %s1187_s21, 4  ;;  %s1188_s26 = smov 768   ;;  %s34_s22 = int_to_ptr.vmem [resolvable:$true] %s33_s22 }
   0x5   :  { %s1189_s27 = smov 48   ;;  %s1190_s28 = smov [#allocation2]  }
   0x6   :  { %39 = dma.hbm_to_vmem [thread:$0]  %s32_s20, 18432, %s34_s22, [#allocation6], %s1188_s26, %s1188_s26, %s1189_s27  }
   0x7   :  { %s20_s29 = sshll.u32 %s1190_s28, 4  ;;  %s1191_s30 = smov 256   ;;  %s21_s29 = int_to_ptr.vmem [resolvable:$true] %s20_s29 }
   0x8   :  { %s1192_s6 = smov 16   ;;  %s45_s8 = sshll.u32 %s1370_s2, 4  ;;  %s46_s8 = int_to_ptr.hbm [resolvable:$true] %s45_s8 }
   0x9   :  { %26 = dma.hbm_to_vmem [thread:$0]  %s19_s25, 512, %s21_s29, [#allocation3], %s1191_s30, %s1191_s30, %s1192_s6  }
   0xa   :  { %s1193_s9 = smov [#allocation7]   ;;  %s55_s12 = sshll.u32 %s1371_s3, 4  ;;  %s56_s12 = int_to_ptr.hbm [resolvable:$true] %s55_s12 }
   0xb   :  { %s47_s0 = sshll.u32 %s1193_s9, 4  ;;  %s1194_s13 = smov [#allocation8]   ;;  %s48_s0 = int_to_ptr.vmem [resolvable:$true] %s47_s0 }
   0xc   :  { %50 = dma.hbm_to_vmem [thread:$0]  %s46_s8, 96, %s48_s0, [#allocation6]  }
   0xd   :  { %s57_s14 = sshll.u32 %s1194_s13, 4  ;;  %s58_s14 = int_to_ptr.vmem [resolvable:$true] %s57_s14 }
   0xe   :  { %63 = dma.hbm_to_vmem [thread:$0]  %s56_s12, 24576, %s58_s14, [#allocation9], %s1191_s30, %s1191_s30, %s1192_s6  }
   0xf   :  { %1179 = dma.done.wait [#allocation3], 512  }
  0x10   :  { %1180 = vsyncadd [#allocation3], 4294966784 }
  0x11   :  { %1181 = dma.done.wait [#allocation6], 18528  }
  0x12   :  { %1182 = vsyncadd [#allocation6], 4294948768 }
  0x13   :  { %1183 = dma.done.wait [#allocation9], 24576  }
  0x14   :  { %1184 = vsyncadd [#allocation9], 4294942720  ;;  %v176_v0 = vld [vmem:[#allocation5 + $0x2d0] sm:$0xff]  ;;  %v177_v2 = vld [vmem:[#allocation5 + $0x2d8] sm:$0xff]  ;;  %vm244_vm0 = vcmask 523264   ;;  %s1023_s18 = sshll.u32 %s1373_s5, 4  ;;  %s1024_s18 = int_to_ptr.hbm [resolvable:$true] %s1023_s18 }
  0x15   :  { %v224_v1 = vld [vmem:[#allocation5 + $0x450] sm:$0xff]  ;;  %251 = vmatpush.msra.mxu0 %v176_v0  ;;  %v225_v3 = vld [vmem:[#allocation5 + $0x458] sm:$0xff]  ;;  %v170_v4 = vld [vmem:[#allocation5 + $0x2a0] sm:$0xff]  ;;  %297 = vmatpush.msra.mxu2 %v177_v2 }
  0x16   :  { %282 = vmatpush.msra.mxu1 %v224_v1  ;;  %v218_v5 = vld [vmem:[#allocation5 + $0x420] sm:$0xff]  ;;  %328 = vmatpush.msra.mxu3 %v225_v3  ;;  %v171_v6 = vld [vmem:[#allocation5 + $0x2a8] sm:$0xff]  ;;  %v164_v8 = vld [vmem:[#allocation5 + $0x270] sm:$0xff] }
  0x17   :  { %v219_v7 = vld [vmem:[#allocation5 + $0x428] sm:$0xff]  ;;  %252 = vmatpush.msra.mxu0 %v170_v4  ;;  %v212_v9 = vld [vmem:[#allocation5 + $0x3f0] sm:$0xff]  ;;  %v165_v10 = vld [vmem:[#allocation5 + $0x278] sm:$0xff]  ;;  %298 = vmatpush.msra.mxu2 %v171_v6 }
  0x18   :  { %283 = vmatpush.msra.mxu1 %v218_v5  ;;  %v213_v11 = vld [vmem:[#allocation5 + $0x3f8] sm:$0xff]  ;;  %329 = vmatpush.msra.mxu3 %v219_v7  ;;  %v158_v12 = vld [vmem:[#allocation5 + $0x240] sm:$0xff]  ;;  %v159_v14 = vld [vmem:[#allocation5 + $0x248] sm:$0xff] }
  0x19   :  { %v206_v13 = vld [vmem:[#allocation5 + $0x3c0] sm:$0xff]  ;;  %253 = vmatpush.msra.mxu0 %v164_v8  ;;  %v207_v15 = vld [vmem:[#allocation5 + $0x3c8] sm:$0xff]  ;;  %299 = vmatpush.msra.mxu2 %v165_v10  ;;  %v152_v16 = vld [vmem:[#allocation5 + $0x210] sm:$0xff] }
  0x1a   :  { %284 = vmatpush.msra.mxu1 %v212_v9  ;;  %330 = vmatpush.msra.mxu3 %v213_v11  ;;  %v200_v17 = vld [vmem:[#allocation5 + $0x390] sm:$0xff]  ;;  %v153_v18 = vld [vmem:[#allocation5 + $0x218] sm:$0xff]  ;;  %v146_v20 = vld [vmem:[#allocation5 + $0x1e0] sm:$0xff] }
  0x1b   :  { %254 = vmatpush.msra.mxu0 %v158_v12  ;;  %v201_v19 = vld [vmem:[#allocation5 + $0x398] sm:$0xff]  ;;  %300 = vmatpush.msra.mxu2 %v159_v14  ;;  %v194_v21 = vld [vmem:[#allocation5 + $0x360] sm:$0xff]  ;;  %v147_v22 = vld [vmem:[#allocation5 + $0x1e8] sm:$0xff] }
  0x1c   :  { %285 = vmatpush.msra.mxu1 %v206_v13  ;;  %331 = vmatpush.msra.mxu3 %v207_v15  ;;  %v195_v23 = vld [vmem:[#allocation5 + $0x368] sm:$0xff]  ;;  %v140_v24 = vld [vmem:[#allocation5 + $0x1b0] sm:$0xff]  ;;  %v141_v26 = vld [vmem:[#allocation5 + $0x1b8] sm:$0xff] }
  0x1d   :  { %255 = vmatpush.msra.mxu0 %v152_v16  ;;  %301 = vmatpush.msra.mxu2 %v153_v18  ;;  %v188_v25 = vld [vmem:[#allocation5 + $0x330] sm:$0xff]  ;;  %v189_v27 = vld [vmem:[#allocation5 + $0x338] sm:$0xff]  ;;  %v134_v28 = vld [vmem:[#allocation5 + $0x180] sm:$0xff] }
  0x1e   :  { %286 = vmatpush.msra.mxu1 %v200_v17  ;;  %332 = vmatpush.msra.mxu3 %v201_v19  ;;  %v182_v29 = vld [vmem:[#allocation5 + $0x300] sm:$0xff]  ;;  %v135_v30 = vld [vmem:[#allocation5 + $0x188] sm:$0xff]  ;;  %v128_v34 = vld [vmem:[#allocation5 + $0x150] sm:$0xff] }
  0x1f   :  { %256 = vmatpush.msra.mxu0 %v146_v20  ;;  %302 = vmatpush.msra.mxu2 %v147_v22  ;;  %v183_v31 = vld [vmem:[#allocation5 + $0x308] sm:$0xff]  ;;  %v178_v32 = vld [vmem:[#allocation5 + $0x2e0] sm:$0xff]  ;;  %v129_v35 = vld [vmem:[#allocation5 + $0x158] sm:$0xff] }
  0x20   :  { %287 = vmatpush.msra.mxu1 %v194_v21  ;;  %333 = vmatpush.msra.mxu3 %v195_v23  ;;  %v226_v33 = vld [vmem:[#allocation5 + $0x460] sm:$0xff]  ;;  %v172_v36 = vld [vmem:[#allocation5 + $0x2b0] sm:$0xff]  ;;  %v123_v39 = vld [vmem:[#allocation5 + $0x128] sm:$0xff] }
  0x21   :  { %257 = vmatpush.msra.mxu0 %v140_v24  ;;  %303 = vmatpush.msra.mxu2 %v141_v26  ;;  %v220_v37 = vld [vmem:[#allocation5 + $0x430] sm:$0xff]  ;;  %v122_v38 = vld [vmem:[#allocation5 + $0x120] sm:$0xff]  ;;  %v117_v43 = vld [vmem:[#allocation5 + $0xf8] sm:$0xff] }
  0x22   :  { %288 = vmatpush.msra.mxu1 %v188_v25  ;;  %334 = vmatpush.msra.mxu3 %v189_v27  ;;  %v166_v40 = vld [vmem:[#allocation5 + $0x280] sm:$0xff]  ;;  %v116_v42 = vld [vmem:[#allocation5 + $0xf0] sm:$0xff]  ;;  %v111_v47 = vld [vmem:[#allocation5 + $0xc8] sm:$0xff] }
  0x23   :  { %258 = vmatpush.msra.mxu0 %v134_v28  ;;  %304 = vmatpush.msra.mxu2 %v135_v30  ;;  %v214_v41 = vld [vmem:[#allocation5 + $0x400] sm:$0xff]  ;;  %v160_v44 = vld [vmem:[#allocation5 + $0x250] sm:$0xff]  ;;  %v105_v51 = vld [vmem:[#allocation5 + $0x98] sm:$0xff] }
  0x24   :  { %289 = vmatpush.msra.mxu1 %v182_v29  ;;  %335 = vmatpush.msra.mxu3 %v183_v31  ;;  %v208_v45 = vld [vmem:[#allocation5 + $0x3d0] sm:$0xff]  ;;  %v110_v46 = vld [vmem:[#allocation5 + $0xc0] sm:$0xff]  ;;  %v99_v55 = vld [vmem:[#allocation5 + $0x68] sm:$0xff] }
  0x25   :  { %259 = vmatpush.msra.mxu0 %v128_v34  ;;  %305 = vmatpush.msra.mxu2 %v129_v35  ;;  %v154_v48 = vld [vmem:[#allocation5 + $0x220] sm:$0xff]  ;;  %v104_v50 = vld [vmem:[#allocation5 + $0x90] sm:$0xff]  ;;  %v1244_v56 = vld [vmem:[#allocation2 + $0x8] sm:$0xff] }
  0x26   :  { %343 = vmatpush.msrb.mxu1 %v178_v32  ;;  %374 = vmatpush.msrb.mxu3 %v226_v33  ;;  %v202_v49 = vld [vmem:[#allocation5 + $0x3a0] sm:$0xff]  ;;  %v148_v52 = vld [vmem:[#allocation5 + $0x1f0] sm:$0xff]  ;;  %v93_v60 = vld [vmem:[#allocation5 + $0x38] sm:$0xff] }
  0x27   :  { %260 = vmatpush.msra.mxu0 %v122_v38  ;;  %306 = vmatpush.msra.mxu2 %v123_v39  ;;  %v196_v53 = vld [vmem:[#allocation5 + $0x370] sm:$0xff]  ;;  %v98_v54 = vld [vmem:[#allocation5 + $0x60] sm:$0xff]  ;;  %v87_v0 = vld [vmem:[#allocation5 + $0x8] sm:$0xff] }
  0x28   :  { %344 = vmatpush.msrb.mxu1 %v172_v36  ;;  %375 = vmatpush.msrb.mxu3 %v220_v37  ;;  %v142_v57 = vld [vmem:[#allocation5 + $0x1c0] sm:$0xff]  ;;  %v92_v59 = vld [vmem:[#allocation5 + $0x30] sm:$0xff]  ;;  %v179_v3 = vld [vmem:[#allocation5 + $0x2e8] sm:$0xff] }
  0x29   :  { %261 = vmatpush.msra.mxu0 %v116_v42  ;;  %307 = vmatpush.msra.mxu2 %v117_v43  ;;  %v190_v58 = vld [vmem:[#allocation5 + $0x340] sm:$0xff]  ;;  %v136_v61 = vld [vmem:[#allocation5 + $0x190] sm:$0xff]  ;;  %v227_v4 = vld [vmem:[#allocation5 + $0x468] sm:$0xff] }
  0x2a   :  { %345 = vmatpush.msrb.mxu1 %v166_v40  ;;  %376 = vmatpush.msrb.mxu3 %v214_v41  ;;  %v184_v62 = vld [vmem:[#allocation5 + $0x310] sm:$0xff]  ;;  %v86_v63 = vld [vmem:[#allocation5] sm:$0xff]  ;;  %v173_v7 = vld [vmem:[#allocation5 + $0x2b8] sm:$0xff] }
  0x2b   :  { %262 = vmatpush.msra.mxu0 %v110_v46  ;;  %308 = vmatpush.msra.mxu2 %v111_v47  ;;  %v180_v1 = vld [vmem:[#allocation5 + $0x2f0] sm:$0xff]  ;;  %v130_v2 = vld [vmem:[#allocation5 + $0x160] sm:$0xff]  ;;  %v221_v8 = vld [vmem:[#allocation5 + $0x438] sm:$0xff] }
  0x2c   :  { %346 = vmatpush.msrb.mxu1 %v160_v44  ;;  %377 = vmatpush.msrb.mxu3 %v208_v45  ;;  %v174_v5 = vld [vmem:[#allocation5 + $0x2c0] sm:$0xff]  ;;  %v124_v6 = vld [vmem:[#allocation5 + $0x130] sm:$0xff]  ;;  %v1250_v9 = vld [vmem:[#allocation2 + $0x18] sm:$0xff] }
  0x2d   :  { %263 = vmatpush.msra.mxu0 %v104_v50  ;;  %309 = vmatpush.msra.mxu2 %v105_v51  ;;  %v118_v10 = vld [vmem:[#allocation5 + $0x100] sm:$0xff]  ;;  %v168_v11 = vld [vmem:[#allocation5 + $0x290] sm:$0xff]  ;;  %v167_v12 = vld [vmem:[#allocation5 + $0x288] sm:$0xff] }
  0x2e   :  { %347 = vmatpush.msrb.mxu1 %v154_v48  ;;  %378 = vmatpush.msrb.mxu3 %v202_v49  ;;  %v215_v13 = vld [vmem:[#allocation5 + $0x408] sm:$0xff]  ;;  %v112_v14 = vld [vmem:[#allocation5 + $0xd0] sm:$0xff]  ;;  %v162_v15 = vld [vmem:[#allocation5 + $0x260] sm:$0xff] }
  0x2f   :  { %264 = vmatpush.msra.mxu0 %v98_v54  ;;  %310 = vmatpush.msra.mxu2 %v99_v55  ;;  %v161_v16 = vld [vmem:[#allocation5 + $0x258] sm:$0xff]  ;;  %v156_v18 = vld [vmem:[#allocation5 + $0x230] sm:$0xff]  ;;  %v106_v19 = vld [vmem:[#allocation5 + $0xa0] sm:$0xff] }
  0x30   :  { %348 = vmatpush.msrb.mxu1 %v148_v52  ;;  %379 = vmatpush.msrb.mxu3 %v196_v53  ;;  %v209_v17 = vld [vmem:[#allocation5 + $0x3d8] sm:$0xff]  ;;  %v155_v20 = vld [vmem:[#allocation5 + $0x228] sm:$0xff]  ;;  %v150_v22 = vld [vmem:[#allocation5 + $0x200] sm:$0xff] }
  0x31   :  { %1040 = vmatmul.msk.f32.vlgmr.msra.gmra.mxu3 %vm244_vm0, %v1244_v56  ;;  %265 = vmatpush.msra.mxu0 %v92_v59  ;;  %v203_v21 = vld [vmem:[#allocation5 + $0x3a8] sm:$0xff]  ;;  %v100_v23 = vld [vmem:[#allocation5 + $0x70] sm:$0xff]  ;;  %v149_v24 = vld [vmem:[#allocation5 + $0x1f8] sm:$0xff] }
  0x32   :  { %349 = vmatpush.msrb.mxu1 %v142_v57  ;;  %380 = vmatpush.msrb.mxu3 %v190_v58  ;;  %v197_v25 = vld [vmem:[#allocation5 + $0x378] sm:$0xff]  ;;  %v1256_v26 = vld [vmem:[#allocation2] sm:$0xff]  ;;  %v144_v27 = vld [vmem:[#allocation5 + $0x1d0] sm:$0xff] }
  0x33   :  { %311 = vmatpush.msra.mxu2 %v93_v60  ;;  %266 = vmatpush.msra.mxu0 %v86_v63  ;;  %v94_v28 = vld [vmem:[#allocation5 + $0x40] sm:$0xff]  ;;  %v143_v29 = vld [vmem:[#allocation5 + $0x1c8] sm:$0xff]  ;;  %v88_v32 = vld [vmem:[#allocation5 + $0x10] sm:$0xff] }
  0x34   :  { %350 = vmatpush.msrb.mxu1 %v136_v61  ;;  %381 = vmatpush.msrb.mxu3 %v184_v62  ;;  %v191_v30 = vld [vmem:[#allocation5 + $0x348] sm:$0xff]  ;;  %v138_v31 = vld [vmem:[#allocation5 + $0x1a0] sm:$0xff]  ;;  %v137_v33 = vld [vmem:[#allocation5 + $0x198] sm:$0xff] }
  0x35   :  { %1038 = vmatmul.msk.f32.vlgmr.msra.gmra.mxu1 %vm244_vm0, %v1244_v56  ;;  %312 = vmatpush.msra.mxu2 %v87_v0  ;;  %v185_v34 = vld [vmem:[#allocation5 + $0x318] sm:$0xff]  ;;  %v132_v35 = vld [vmem:[#allocation5 + $0x170] sm:$0xff]  ;;  %v131_v37 = vld [vmem:[#allocation5 + $0x168] sm:$0xff] }
  0x36   :  { %435 = vmatpush.msra.mxu3 %v180_v1  ;;  %351 = vmatpush.msrb.mxu1 %v130_v2  ;;  %v181_v36 = vld [vmem:[#allocation5 + $0x2f8] sm:$0xff]  ;;  %v228_v38 = vld [vmem:[#allocation5 + $0x470] sm:$0xff]  ;;  %v126_v39 = vld [vmem:[#allocation5 + $0x140] sm:$0xff] }
  0x37   :  { %389 = vmatpush.msrb.mxu0 %v179_v3  ;;  %420 = vmatpush.msrb.mxu2 %v227_v4  ;;  %v175_v40 = vld [vmem:[#allocation5 + $0x2c8] sm:$0xff]  ;;  %v125_v41 = vld [vmem:[#allocation5 + $0x138] sm:$0xff]  ;;  %v1263_v42 = vld [vmem:[#allocation2 + $0x10] sm:$0xff] }
  0x38   :  { %436 = vmatpush.msra.mxu3 %v174_v5  ;;  %352 = vmatpush.msrb.mxu1 %v124_v6  ;;  %v169_v43 = vld [vmem:[#allocation5 + $0x298] sm:$0xff]  ;;  %v120_v44 = vld [vmem:[#allocation5 + $0x110] sm:$0xff]  ;;  %v119_v45 = vld [vmem:[#allocation5 + $0x108] sm:$0xff] }
  0x39   :  { %390 = vmatpush.msrb.mxu0 %v173_v7  ;;  %421 = vmatpush.msrb.mxu2 %v221_v8  ;;  %v163_v46 = vld [vmem:[#allocation5 + $0x268] sm:$0xff]  ;;  %v222_v47 = vld [vmem:[#allocation5 + $0x440] sm:$0xff]  ;;  %v113_v49 = vld [vmem:[#allocation5 + $0xd8] sm:$0xff] }
  0x3a   :  { %1041 = vmatmul.msk.f32.gmra.mxu3 %vm244_vm0, %v1250_v9  ;;  %353 = vmatpush.msrb.mxu1 %v118_v10  ;;  %v114_v48 = vld [vmem:[#allocation5 + $0xe0] sm:$0xff]  ;;  %v108_v50 = vld [vmem:[#allocation5 + $0xb0] sm:$0xff]  ;;  %v157_v51 = vld [vmem:[#allocation5 + $0x238] sm:$0xff] }
  0x3b   :  { %437 = vmatpush.msra.mxu3 %v168_v11  ;;  %391 = vmatpush.msrb.mxu0 %v167_v12  ;;  %v107_v52 = vld [vmem:[#allocation5 + $0xa8] sm:$0xff]  ;;  %v216_v53 = vld [vmem:[#allocation5 + $0x410] sm:$0xff]  ;;  %v102_v54 = vld [vmem:[#allocation5 + $0x80] sm:$0xff] }
  0x3c   :  { %422 = vmatpush.msrb.mxu2 %v215_v13  ;;  %354 = vmatpush.msrb.mxu1 %v112_v14  ;;  %v151_v55 = vld [vmem:[#allocation5 + $0x208] sm:$0xff]  ;;  %v101_v57 = vld [vmem:[#allocation5 + $0x78] sm:$0xff]  ;;  %v96_v58 = vld [vmem:[#allocation5 + $0x50] sm:$0xff] }
  0x3d   :  { %438 = vmatpush.msra.mxu3 %v162_v15  ;;  %392 = vmatpush.msrb.mxu0 %v161_v16  ;;  %v145_v59 = vld [vmem:[#allocation5 + $0x1d8] sm:$0xff]  ;;  %v95_v60 = vld [vmem:[#allocation5 + $0x48] sm:$0xff]  ;;  %v210_v61 = vld [vmem:[#allocation5 + $0x3e0] sm:$0xff] }
  0x3e   :  { %423 = vmatpush.msrb.mxu2 %v209_v17  ;;  %1039 = vmatmul.msk.f32.gmra.mxu1 %vm244_vm0, %v1250_v9  ;;  %v90_v62 = vld [vmem:[#allocation5 + $0x20] sm:$0xff]  ;;  %v139_v63 = vld [vmem:[#allocation5 + $0x1a8] sm:$0xff]  ;;  %v89_v0 = vld [vmem:[#allocation5 + $0x18] sm:$0xff] }
  0x3f   :  { %439 = vmatpush.msra.mxu3 %v156_v18  ;;  %355 = vmatpush.msrb.mxu1 %v106_v19  ;;  %v204_v1 = vld [vmem:[#allocation5 + $0x3b0] sm:$0xff]  ;;  %v133_v2 = vld [vmem:[#allocation5 + $0x178] sm:$0xff]  ;;  %v198_v4 = vld [vmem:[#allocation5 + $0x380] sm:$0xff] }
  0x40   :  { %393 = vmatpush.msrb.mxu0 %v155_v20  ;;  %424 = vmatpush.msrb.mxu2 %v203_v21  ;;  %v229_v3 = vld [vmem:[#allocation5 + $0x478] sm:$0xff]  ;;  %v127_v5 = vld [vmem:[#allocation5 + $0x148] sm:$0xff]  ;;  %v192_v8 = vld [vmem:[#allocation5 + $0x350] sm:$0xff] }
  0x41   :  { %440 = vmatpush.msra.mxu3 %v150_v22  ;;  %356 = vmatpush.msrb.mxu1 %v100_v23  ;;  %v223_v6 = vld [vmem:[#allocation5 + $0x448] sm:$0xff]  ;;  %v601_v7 = vld [vmem:[#allocation8 + $0x1f0] sm:$0xff]  ;;  %v186_v12 = vld [vmem:[#allocation5 + $0x320] sm:$0xff] }
  0x42   :  { %394 = vmatpush.msrb.mxu0 %v149_v24  ;;  %425 = vmatpush.msrb.mxu2 %v197_v25  ;;  %v121_v10 = vld [vmem:[#allocation5 + $0x118] sm:$0xff]  ;;  %v599_v13 = vld [vmem:[#allocation8 + $0x1e0] sm:$0xff] }
  0x43   :  { %313 = vmatmul.f32.vlgmr.msra.gmra.mxu2 %v1256_v26  ;;  %1042 = vmatmul.msk.f32.vlgmr.msrb.gmra.mxu3 %vm244_vm0, %v1244_v56  ;;  %v217_v11 = vld [vmem:[#allocation5 + $0x418] sm:$0xff]  ;;  %v115_v14 = vld [vmem:[#allocation5 + $0xe8] sm:$0xff] }
  0x44   :  { %441 = vmatpush.msra.mxu3 %v144_v27  ;;  %357 = vmatpush.msrb.mxu1 %v94_v28  ;;  %v109_v15 = vld [vmem:[#allocation5 + $0xb8] sm:$0xff]  ;;  %v211_v16 = vld [vmem:[#allocation5 + $0x3e8] sm:$0xff] }
  0x45   :  { %395 = vmatpush.msrb.mxu0 %v143_v29  ;;  %426 = vmatpush.msrb.mxu2 %v191_v30  ;;  %v569_v17 = vld [vmem:[#allocation8 + $0xf0] sm:$0xff]  ;;  %v103_v19 = vld [vmem:[#allocation5 + $0x88] sm:$0xff] }
  0x46   :  { %442 = vmatpush.msra.mxu3 %v138_v31  ;;  %358 = vmatpush.msrb.mxu1 %v88_v32  ;;  %v597_v18 = vld [vmem:[#allocation8 + $0x1d0] sm:$0xff]  ;;  %v567_v21 = vld [vmem:[#allocation8 + $0xe0] sm:$0xff] }
  0x47   :  { %396 = vmatpush.msrb.mxu0 %v137_v33  ;;  %427 = vmatpush.msrb.mxu2 %v185_v34  ;;  %v205_v20 = vld [vmem:[#allocation5 + $0x3b8] sm:$0xff]  ;;  %v595_v22 = vld [vmem:[#allocation8 + $0x1c0] sm:$0xff] }
  0x48   :  { %267 = vmatmul.f32.vlgmr.msra.gmra.mxu0 %v1256_v26  ;;  %359 = vmatmul.f32.vlgmr.msrb.gmra.mxu1 %v1256_v26  ;;  %v97_v23 = vld [vmem:[#allocation5 + $0x58] sm:$0xff]  ;;  %v199_v24 = vld [vmem:[#allocation5 + $0x388] sm:$0xff] }
  0x49   :  { %443 = vmatpush.msra.mxu3 %v132_v35  ;;  %481 = vmatpush.msra.mxu2 %v181_v36  ;;  %v565_v25 = vld [vmem:[#allocation8 + $0xd0] sm:$0xff]  ;;  %v91_v28 = vld [vmem:[#allocation5 + $0x28] sm:$0xff] }
  0x4a   :  { %397 = vmatpush.msrb.mxu0 %v131_v37  ;;  %466 = vmatpush.msra.mxu1 %v228_v38  ;;  %v593_v27 = vld [vmem:[#allocation8 + $0x1b0] sm:$0xff]  ;;  %v187_v30 = vld [vmem:[#allocation5 + $0x328] sm:$0xff] }
  0x4b   :  { %444 = vmatpush.msra.mxu3 %v126_v39  ;;  %482 = vmatpush.msra.mxu2 %v175_v40  ;;  %v193_v29 = vld [vmem:[#allocation5 + $0x358] sm:$0xff]  ;;  %v563_v31 = vld [vmem:[#allocation8 + $0xc0] sm:$0xff] }
  0x4c   :  { %398 = vmatpush.msrb.mxu0 %v125_v41  ;;  %316 = vmatmul.f32.gmra.mxu2 %v1263_v42  ;;  %v665_v32 = vld [vmem:[#allocation8 + $0x3f0] sm:$0xff]  ;;  %v663_v35 = vld [vmem:[#allocation8 + $0x3e0] sm:$0xff] }
  0x4d   :  { %1043 = vmatmul.msk.f32.gmra.mxu3 %vm244_vm0, %v1250_v9  ;;  %483 = vmatpush.msra.mxu2 %v169_v43  ;;  %v633_v33 = vld [vmem:[#allocation8 + $0x2f0] sm:$0xff]  ;;  %v591_v36 = vld [vmem:[#allocation8 + $0x1a0] sm:$0xff] }
  0x4e   :  { %445 = vmatpush.msra.mxu3 %v120_v44  ;;  %399 = vmatpush.msrb.mxu0 %v119_v45  ;;  %v561_v34 = vld [vmem:[#allocation8 + $0xb0] sm:$0xff]  ;;  %v631_v37 = vld [vmem:[#allocation8 + $0x2e0] sm:$0xff] }
  0x4f   :  { %484 = vmatpush.msra.mxu2 %v163_v46  ;;  %467 = vmatpush.msra.mxu1 %v222_v47  ;;  %v559_v38 = vld [vmem:[#allocation8 + $0xa0] sm:$0xff]  ;;  %v661_v39 = vld [vmem:[#allocation8 + $0x3d0] sm:$0xff] }
  0x50   :  { %446 = vmatpush.msra.mxu3 %v114_v48  ;;  %400 = vmatpush.msrb.mxu0 %v113_v49  ;;  %v589_v40 = vld [vmem:[#allocation8 + $0x190] sm:$0xff]  ;;  %v627_v44 = vld [vmem:[#allocation8 + $0x2c0] sm:$0xff] }
  0x51   :  { %270 = vmatmul.f32.gmra.mxu0 %v1263_v42  ;;  %362 = vmatmul.f32.gmra.mxu1 %v1263_v42  ;;  %v629_v41 = vld [vmem:[#allocation8 + $0x2d0] sm:$0xff]  ;;  %v555_v45 = vld [vmem:[#allocation8 + $0x80] sm:$0xff] }
  0x52   :  { %447 = vmatpush.msra.mxu3 %v108_v50  ;;  %485 = vmatpush.msra.mxu2 %v157_v51  ;;  %v557_v43 = vld [vmem:[#allocation8 + $0x90] sm:$0xff]  ;;  %v623_v50 = vld [vmem:[#allocation8 + $0x2a0] sm:$0xff] }
  0x53   :  { %401 = vmatpush.msrb.mxu0 %v107_v52  ;;  %468 = vmatpush.msra.mxu1 %v216_v53  ;;  %v625_v46 = vld [vmem:[#allocation8 + $0x2b0] sm:$0xff]  ;;  %v551_v51 = vld [vmem:[#allocation8 + $0x60] sm:$0xff] }
  0x54   :  { %448 = vmatpush.msra.mxu3 %v102_v54  ;;  %486 = vmatpush.msra.mxu2 %v151_v55  ;;  %v553_v47 = vld [vmem:[#allocation8 + $0x70] sm:$0xff]  ;;  %v655_v52 = vld [vmem:[#allocation8 + $0x3a0] sm:$0xff] }
  0x55   :  { %402 = vmatpush.msrb.mxu0 %v101_v57  ;;  %1044 = vmatmul.msk.f32.vlgmr.msrb.gmra.mxu2 %vm244_vm0, %v1244_v56  ;;  %v657_v48 = vld [vmem:[#allocation8 + $0x3b0] sm:$0xff]  ;;  %v619_v55 = vld [vmem:[#allocation8 + $0x280] sm:$0xff] }
  0x56   :  { %449 = vmatpush.msra.mxu3 %v96_v58  ;;  %487 = vmatpush.msra.mxu2 %v145_v59  ;;  %v585_v49 = vld [vmem:[#allocation8 + $0x170] sm:$0xff]  ;;  %v547_v57 = vld [vmem:[#allocation8 + $0x40] sm:$0xff] }
  0x57   :  { %403 = vmatpush.msrb.mxu0 %v95_v60  ;;  %469 = vmatpush.msra.mxu1 %v210_v61  ;;  %v621_v53 = vld [vmem:[#allocation8 + $0x290] sm:$0xff]  ;;  %v651_v58 = vld [vmem:[#allocation8 + $0x380] sm:$0xff] }
  0x58   :  { %450 = vmatpush.msra.mxu3 %v90_v62  ;;  %488 = vmatpush.msra.mxu2 %v139_v63  ;;  %v549_v54 = vld [vmem:[#allocation8 + $0x50] sm:$0xff]  ;;  %v615_v61 = vld [vmem:[#allocation8 + $0x260] sm:$0xff] }
  0x59   :  { %404 = vmatpush.msrb.mxu0 %v89_v0  ;;  %451 = vmatmul.f32.vlgmr.msra.gmra.mxu3 %v1256_v26  ;;  %v545_v59 = vld [vmem:[#allocation8 + $0x30] sm:$0xff]  ;;  %v543_v62 = vld [vmem:[#allocation8 + $0x20] sm:$0xff] }
  0x5a   :  { %405 = vmatmul.f32.vlgmr.msrb.gmra.mxu0 %v1256_v26  ;;  %470 = vmatpush.msra.mxu1 %v204_v1  ;;  %v649_v60 = vld [vmem:[#allocation8 + $0x370] sm:$0xff]  ;;  %v647_v63 = vld [vmem:[#allocation8 + $0x360] sm:$0xff] }
  0x5b   :  { %489 = vmatpush.msra.mxu2 %v133_v2  ;;  %512 = vmatpush.msra.mxu0 %v229_v3  ;;  %v613_v0 = vld [vmem:[#allocation8 + $0x250] sm:$0xff]  ;;  %v611_v3 = vld [vmem:[#allocation8 + $0x240] sm:$0xff] }
  0x5c   :  { %471 = vmatpush.msra.mxu1 %v198_v4  ;;  %760 = vmatpush.msrb.mxu3 %v601_v7  ;;  %v541_v1 = vld [vmem:[#allocation8 + $0x10] sm:$0xff]  ;;  %v539_v4 = vld [vmem:[#allocation8] sm:$0xff] }
  0x5d   :  { %490 = vmatpush.msra.mxu2 %v127_v5  ;;  %513 = vmatpush.msra.mxu0 %v223_v6  ;;  %v645_v2 = vld [vmem:[#allocation8 + $0x350] sm:$0xff]  ;;  %v607_v7 = vld [vmem:[#allocation8 + $0x220] sm:$0xff] }
  0x5e   :  { %1045 = vmatmul.msk.f32.gmra.mxu2 %vm244_vm0, %v1250_v9  ;;  %472 = vmatpush.msra.mxu1 %v192_v8  ;;  %v697_v5 = vld [vmem:[#allocation8 + $0x4f0] sm:$0xff] }
  0x5f   :  { %491 = vmatpush.msra.mxu2 %v121_v10  ;;  %514 = vmatpush.msra.mxu0 %v217_v11  ;;  %v609_v6 = vld [vmem:[#allocation8 + $0x230] sm:$0xff]  ;;  %v643_v10 = vld [vmem:[#allocation8 + $0x340] sm:$0xff] }
  0x60   :  { %473 = vmatpush.msra.mxu1 %v186_v12  ;;  %761 = vmatpush.msrb.mxu3 %v599_v13  ;;  %v605_v8 = vld [vmem:[#allocation8 + $0x210] sm:$0xff]  ;;  %v695_v11 = vld [vmem:[#allocation8 + $0x4e0] sm:$0xff] }
  0x61   :  { %492 = vmatpush.msra.mxu2 %v115_v14  ;;  %454 = vmatmul.f32.gmra.mxu3 %v1263_v42  ;;  %v583_v12 = vld [vmem:[#allocation8 + $0x160] sm:$0xff]  ;;  %v641_v14 = vld [vmem:[#allocation8 + $0x330] sm:$0xff] }
  0x62   :  { %1046 = vmatmul.msk.f32.vlgmr.msra.gmra.mxu1 %vm244_vm0, %v1244_v56  ;;  %408 = vmatmul.f32.gmra.mxu0 %v1263_v42  ;;  %v603_v13 = vld [vmem:[#allocation8 + $0x200] sm:$0xff] }
  0x63   :  { %493 = vmatpush.msra.mxu2 %v109_v15  ;;  %515 = vmatpush.msra.mxu0 %v211_v16  ;;  %v693_v15 = vld [vmem:[#allocation8 + $0x4d0] sm:$0xff]  ;;  %v570_v16 = vld [vmem:[#allocation8 + $0xf8] sm:$0xff] }
  0x64   :  { %737 = vmatpush.msrb.mxu1 %v569_v17  ;;  %762 = vmatpush.msrb.mxu3 %v597_v18  ;;  %v581_v17 = vld [vmem:[#allocation8 + $0x150] sm:$0xff]  ;;  %v639_v18 = vld [vmem:[#allocation8 + $0x320] sm:$0xff] }
  0x65   :  { %494 = vmatpush.msra.mxu2 %v103_v19  ;;  %516 = vmatpush.msra.mxu0 %v205_v20  ;;  %v691_v19 = vld [vmem:[#allocation8 + $0x4c0] sm:$0xff]  ;;  %v568_v20 = vld [vmem:[#allocation8 + $0xe8] sm:$0xff] }
  0x66   :  { %738 = vmatpush.msrb.mxu1 %v567_v21  ;;  %763 = vmatpush.msrb.mxu3 %v595_v22  ;;  %v579_v21 = vld [vmem:[#allocation8 + $0x140] sm:$0xff]  ;;  %v637_v22 = vld [vmem:[#allocation8 + $0x310] sm:$0xff] }
  0x67   :  { %495 = vmatpush.msra.mxu2 %v97_v23  ;;  %517 = vmatpush.msra.mxu0 %v199_v24  ;;  %v689_v23 = vld [vmem:[#allocation8 + $0x4b0] sm:$0xff]  ;;  %v566_v24 = vld [vmem:[#allocation8 + $0xd8] sm:$0xff] }
  0x68   :  { %739 = vmatpush.msrb.mxu1 %v565_v25  ;;  %764 = vmatpush.msrb.mxu3 %v593_v27  ;;  %v577_v25 = vld [vmem:[#allocation8 + $0x130] sm:$0xff]  ;;  %v635_v27 = vld [vmem:[#allocation8 + $0x300] sm:$0xff] }
  0x69   :  { %496 = vmatpush.msra.mxu2 %v91_v28  ;;  %518 = vmatpush.msra.mxu0 %v193_v29  ;;  %v687_v28 = vld [vmem:[#allocation8 + $0x4a0] sm:$0xff]  ;;  %v564_v29 = vld [vmem:[#allocation8 + $0xc8] sm:$0xff] }
  0x6a   :  { %1047 = vmatmul.msk.f32.gmra.mxu1 %vm244_vm0, %v1250_v9  ;;  %497 = vmatmul.f32.vlgmr.msra.gmra.mxu2 %v1256_v26  ;;  %v587_v26 = vld [vmem:[#allocation8 + $0x180] sm:$0xff] }
  0x6b   :  { %519 = vmatpush.msra.mxu0 %v187_v30  ;;  %740 = vmatpush.msrb.mxu1 %v563_v31  ;;  %v575_v30 = vld [vmem:[#allocation8 + $0x120] sm:$0xff]  ;;  %v602_v31 = vld [vmem:[#allocation8 + $0x1f8] sm:$0xff] }
  0x6c   :  { %1048 = vmatmul.msk.f32.vlgmr.msra.gmra.mxu0 %vm244_vm0, %v1244_v56  ;;  %806 = vmatpush.msrb.mxu2 %v665_v32  ;;  %v659_v56 = vld [vmem:[#allocation8 + $0x3c0] sm:$0xff]  ;;  %v685_v32 = vld [vmem:[#allocation8 + $0x490] sm:$0xff] }
  0x6d   :  { %783 = vmatpush.msrb.mxu0 %v633_v33  ;;  %741 = vmatpush.msrb.mxu1 %v561_v34  ;;  %v562_v33 = vld [vmem:[#allocation8 + $0xb8] sm:$0xff]  ;;  %v573_v34 = vld [vmem:[#allocation8 + $0x110] sm:$0xff] }
  0x6e   :  { %807 = vmatpush.msrb.mxu2 %v663_v35  ;;  %765 = vmatpush.msrb.mxu3 %v591_v36  ;;  %v600_v35 = vld [vmem:[#allocation8 + $0x1e8] sm:$0xff]  ;;  %v683_v36 = vld [vmem:[#allocation8 + $0x480] sm:$0xff] }
  0x6f   :  { %784 = vmatpush.msrb.mxu0 %v631_v37  ;;  %742 = vmatpush.msrb.mxu1 %v559_v38  ;;  %v560_v37 = vld [vmem:[#allocation8 + $0xa8] sm:$0xff]  ;;  %v571_v38 = vld [vmem:[#allocation8 + $0x100] sm:$0xff] }
  0x70   :  { %808 = vmatpush.msrb.mxu2 %v661_v39  ;;  %766 = vmatpush.msrb.mxu3 %v589_v40  ;;  %v598_v39 = vld [vmem:[#allocation8 + $0x1d8] sm:$0xff]  ;;  %v681_v40 = vld [vmem:[#allocation8 + $0x470] sm:$0xff] }
  0x71   :  { %785 = vmatpush.msrb.mxu0 %v629_v41  ;;  %743 = vmatpush.msrb.mxu1 %v557_v43  ;;  %v729_v41 = vld [vmem:[#allocation8 + $0x5f0] sm:$0xff]  ;;  %v558_v43 = vld [vmem:[#allocation8 + $0x98] sm:$0xff] }
  0x72   :  { %500 = vmatmul.f32.gmra.mxu2 %v1263_v42  ;;  %767 = vmatpush.msrb.mxu3 %v587_v26  ;;  %v653_v42 = vld [vmem:[#allocation8 + $0x390] sm:$0xff]  ;;  %v596_v26 = vld [vmem:[#allocation8 + $0x1c8] sm:$0xff] }
  0x73   :  { %786 = vmatpush.msrb.mxu0 %v627_v44  ;;  %744 = vmatpush.msrb.mxu1 %v555_v45  ;;  %v679_v44 = vld [vmem:[#allocation8 + $0x460] sm:$0xff] }
  0x74   :  { %1049 = vmatmul.msk.f32.gmra.mxu0 %vm244_vm0, %v1250_v9  ;;  %809 = vmatpush.msrb.mxu2 %v659_v56  ;;  %v617_v9 = vld [vmem:[#allocation8 + $0x270] sm:$0xff]  ;;  %v727_v45 = vld [vmem:[#allocation8 + $0x5e0] sm:$0xff]  ;;  %v556_v56 = vld [vmem:[#allocation8 + $0x88] sm:$0xff] }
  0x75   :  { %787 = vmatpush.msrb.mxu0 %v625_v46  ;;  %745 = vmatpush.msrb.mxu1 %v553_v47  ;;  %v594_v46 = vld [vmem:[#allocation8 + $0x1b8] sm:$0xff]  ;;  %v677_v47 = vld [vmem:[#allocation8 + $0x450] sm:$0xff] }
  0x76   :  { %810 = vmatpush.msrb.mxu2 %v657_v48  ;;  %768 = vmatpush.msrb.mxu3 %v585_v49  ;;  %v725_v48 = vld [vmem:[#allocation8 + $0x5d0] sm:$0xff]  ;;  %v554_v49 = vld [vmem:[#allocation8 + $0x78] sm:$0xff] }
  0x77   :  { %788 = vmatpush.msrb.mxu0 %v623_v50  ;;  %746 = vmatpush.msrb.mxu1 %v551_v51  ;;  %v592_v50 = vld [vmem:[#allocation8 + $0x1a8] sm:$0xff]  ;;  %v675_v51 = vld [vmem:[#allocation8 + $0x440] sm:$0xff] }
  0x78   :  { %811 = vmatpush.msrb.mxu2 %v655_v52  ;;  %769 = vmatpush.msrb.mxu3 %v583_v12  ;;  %v723_v52 = vld [vmem:[#allocation8 + $0x5c0] sm:$0xff] }
  0x79   :  { %789 = vmatpush.msrb.mxu0 %v621_v53  ;;  %747 = vmatpush.msrb.mxu1 %v549_v54  ;;  %v552_v53 = vld [vmem:[#allocation8 + $0x68] sm:$0xff]  ;;  %v590_v54 = vld [vmem:[#allocation8 + $0x198] sm:$0xff]  ;;  %v711_v12 = vld [vmem:[#allocation8 + $0x560] sm:$0xff] }
  0x7a   :  { %812 = vmatpush.msrb.mxu2 %v653_v42  ;;  %770 = vmatpush.msrb.mxu3 %v581_v17  ;;  %v673_v42 = vld [vmem:[#allocation8 + $0x430] sm:$0xff] }
  0x7b   :  { %790 = vmatpush.msrb.mxu0 %v619_v55  ;;  %748 = vmatpush.msrb.mxu1 %v547_v57  ;;  %v721_v55 = vld [vmem:[#allocation8 + $0x5b0] sm:$0xff]  ;;  %v550_v57 = vld [vmem:[#allocation8 + $0x58] sm:$0xff] }
  0x7c   :  { %813 = vmatpush.msrb.mxu2 %v651_v58  ;;  %771 = vmatpush.msrb.mxu3 %v579_v21  ;;  %v588_v58 = vld [vmem:[#allocation8 + $0x188] sm:$0xff]  ;;  %v705_v21 = vld [vmem:[#allocation8 + $0x530] sm:$0xff] }
  0x7d   :  { %791 = vmatpush.msrb.mxu0 %v617_v9  ;;  %749 = vmatpush.msrb.mxu1 %v545_v59  ;;  %v671_v9 = vld [vmem:[#allocation8 + $0x420] sm:$0xff] }
  0x7e   :  { %814 = vmatpush.msrb.mxu2 %v649_v60  ;;  %772 = vmatpush.msrb.mxu3 %v577_v25  ;;  %v719_v59 = vld [vmem:[#allocation8 + $0x5a0] sm:$0xff]  ;;  %v548_v60 = vld [vmem:[#allocation8 + $0x48] sm:$0xff]  ;;  %v701_v25 = vld [vmem:[#allocation8 + $0x510] sm:$0xff] }
  0x7f   :  { %792 = vmatpush.msrb.mxu0 %v615_v61  ;;  %750 = vmatpush.msrb.mxu1 %v543_v62  ;;  %v586_v61 = vld [vmem:[#allocation8 + $0x178] sm:$0xff]  ;;  %v669_v62 = vld [vmem:[#allocation8 + $0x410] sm:$0xff] }
  0x80   :  { %815 = vmatpush.msrb.mxu2 %v647_v63  ;;  %773 = vmatpush.msrb.mxu3 %v575_v30  ;;  %v717_v63 = vld [vmem:[#allocation8 + $0x590] sm:$0xff]  ;;  %v699_v30 = vld [vmem:[#allocation8 + $0x500] sm:$0xff] }
  0x81   :  { %793 = vmatpush.msrb.mxu0 %v613_v0  ;;  %751 = vmatpush.msrb.mxu1 %v541_v1  ;;  %v546_v0 = vld [vmem:[#allocation8 + $0x38] sm:$0xff] }
  0x82   :  { %816 = vmatpush.msrb.mxu2 %v645_v2  ;;  %774 = vmatpush.msrb.mxu3 %v573_v34  ;;  %v584_v2 = vld [vmem:[#allocation8 + $0x168] sm:$0xff] }
  0x83   :  { %794 = vmatpush.msrb.mxu0 %v611_v3  ;;  %752 = vmatpush.msrb.mxu1 %v539_v4  ;;  %v667_v3 = vld [vmem:[#allocation8 + $0x400] sm:$0xff] }
  0x84   :  { %817 = vmatpush.msrb.mxu2 %v643_v10  ;;  %775 = vmatpush.msrb.mxu3 %v571_v38  ;;  %v715_v4 = vld [vmem:[#allocation8 + $0x580] sm:$0xff]  ;;  %v542_v10 = vld [vmem:[#allocation8 + $0x18] sm:$0xff] }
  0x85   :  { %829 = vmatpush.msra.mxu1 %v697_v5  ;;  %795 = vmatpush.msrb.mxu0 %v609_v6  ;;  %v544_v5 = vld [vmem:[#allocation8 + $0x28] sm:$0xff] }
  0x86   :  { %818 = vmatpush.msrb.mxu2 %v641_v14  ;;  %852 = vmatpush.msra.mxu3 %v729_v41  ;;  %v578_v14 = vld [vmem:[#allocation8 + $0x138] sm:$0xff] }
  0x87   :  { %796 = vmatpush.msrb.mxu0 %v607_v7  ;;  %830 = vmatpush.msra.mxu1 %v695_v11  ;;  %v582_v7 = vld [vmem:[#allocation8 + $0x158] sm:$0xff]  ;;  %v580_v11 = vld [vmem:[#allocation8 + $0x148] sm:$0xff] }
  0x88   :  { %819 = vmatpush.msrb.mxu2 %v639_v18  ;;  %853 = vmatpush.msra.mxu3 %v727_v45  ;;  %v707_v18 = vld [vmem:[#allocation8 + $0x540] sm:$0xff]  ;;  %v698_v45 = vld [vmem:[#allocation8 + $0x4f8] sm:$0xff] }
  0x89   :  { %797 = vmatpush.msrb.mxu0 %v605_v8  ;;  %831 = vmatpush.msra.mxu1 %v693_v15  ;;  %v713_v8 = vld [vmem:[#allocation8 + $0x570] sm:$0xff] }
  0x8a   :  { %820 = vmatpush.msrb.mxu2 %v637_v22  ;;  %854 = vmatpush.msra.mxu3 %v725_v48  ;;  %v709_v15 = vld [vmem:[#allocation8 + $0x550] sm:$0xff]  ;;  %v572_v22 = vld [vmem:[#allocation8 + $0x108] sm:$0xff] }
  0x8b   :  { %798 = vmatpush.msrb.mxu0 %v603_v13  ;;  %832 = vmatpush.msra.mxu1 %v691_v19  ;;  %v540_v13 = vld [vmem:[#allocation8 + $0x8] sm:$0xff]  ;;  %v574_v19 = vld [vmem:[#allocation8 + $0x118] sm:$0xff] }
  0x8c   :  { %821 = vmatpush.msrb.mxu2 %v635_v27  ;;  %855 = vmatpush.msra.mxu3 %v723_v52  ;;  %v664_v48 = vld [vmem:[#allocation8 + $0x3e8] sm:$0xff] }
  0x8d   :  { %875 = vmatpush.msra.mxu0 %v570_v16  ;;  %833 = vmatpush.msra.mxu1 %v689_v23  ;;  %v576_v16 = vld [vmem:[#allocation8 + $0x128] sm:$0xff]  ;;  %v1288_v23 = vld [vmem:[#allocation7] sm:$0x3f] }
  0x8e   :  { %898 = vmatpush.msra.mxu2 %v602_v31  ;;  %856 = vmatpush.msra.mxu3 %v721_v55  ;;  %v232_v27 = vperm.slane %v1288_v23, 0  ;;  %v662_v55 = vld [vmem:[#allocation8 + $0x3d8] sm:$0xff] }
  0x8f   :  { %876 = vmatpush.msra.mxu0 %v568_v20  ;;  %834 = vmatpush.msra.mxu1 %v687_v28  ;;  %v234_v28 = vperm.slane %v1288_v23, 2 }
  0x90   :  { %899 = vmatpush.msra.mxu2 %v600_v35  ;;  %857 = vmatpush.msra.mxu3 %v719_v59 }
  0x91   :  { %877 = vmatpush.msra.mxu0 %v566_v24  ;;  %835 = vmatpush.msra.mxu1 %v685_v32  ;;  %v703_v24 = vld [vmem:[#allocation8 + $0x520] sm:$0xff] }
  0x92   :  { %900 = vmatpush.msra.mxu2 %v598_v39  ;;  %858 = vmatpush.msra.mxu3 %v717_v63 }
  0x93   :  { %878 = vmatpush.msra.mxu0 %v564_v29  ;;  %836 = vmatpush.msra.mxu1 %v683_v36  ;;  %v233_v29 = vperm.slane %v1288_v23, 1 }
  0x94   :  { %901 = vmatpush.msra.mxu2 %v596_v26  ;;  %859 = vmatpush.msra.mxu3 %v715_v4  ;;  %v634_v26 = vld [vmem:[#allocation8 + $0x2f8] sm:$0xff] }
  0x95   :  { %879 = vmatpush.msra.mxu0 %v562_v33  ;;  %837 = vmatpush.msra.mxu1 %v681_v40 }
  0x96   :  { %902 = vmatpush.msra.mxu2 %v594_v46  ;;  %860 = vmatpush.msra.mxu3 %v713_v8  ;;  %v632_v46 = vld [vmem:[#allocation8 + $0x2e8] sm:$0xff] }
  0x97   :  { %880 = vmatpush.msra.mxu0 %v560_v37  ;;  %838 = vmatpush.msra.mxu1 %v679_v44  ;;  %v688_v8 = vld [vmem:[#allocation8 + $0x4a8] sm:$0xff] }
  0x98   :  { %903 = vmatpush.msra.mxu2 %v592_v50  ;;  %861 = vmatpush.msra.mxu3 %v711_v12  ;;  %v622_v12 = vld [vmem:[#allocation8 + $0x298] sm:$0xff] }
  0x99   :  { %881 = vmatpush.msra.mxu0 %v558_v43  ;;  %839 = vmatpush.msra.mxu1 %v677_v47  ;;  %v696_v47 = vld [vmem:[#allocation8 + $0x4e8] sm:$0xff] }
  0x9a   :  { %904 = vmatpush.msra.mxu2 %v590_v54  ;;  %862 = vmatpush.msra.mxu3 %v709_v15  ;;  %v686_v15 = vld [vmem:[#allocation8 + $0x498] sm:$0xff] }
  0x9b   :  { %882 = vmatpush.msra.mxu0 %v556_v56  ;;  %840 = vmatpush.msra.mxu1 %v675_v51  ;;  %v666_v56 = vld [vmem:[#allocation8 + $0x3f8] sm:$0xff] }
  0x9c   :  { %905 = vmatpush.msra.mxu2 %v588_v58  ;;  %863 = vmatpush.msra.mxu3 %v707_v18  ;;  %v630_v51 = vld [vmem:[#allocation8 + $0x2d8] sm:$0xff]  ;;  %v620_v18 = vld [vmem:[#allocation8 + $0x288] sm:$0xff] }
  0x9d   :  { %883 = vmatpush.msra.mxu0 %v554_v49  ;;  %841 = vmatpush.msra.mxu1 %v673_v42  ;;  %v694_v42 = vld [vmem:[#allocation8 + $0x4d8] sm:$0xff] }
  0x9e   :  { %906 = vmatpush.msra.mxu2 %v586_v61  ;;  %864 = vmatpush.msra.mxu3 %v705_v21  ;;  %v692_v61 = vld [vmem:[#allocation8 + $0x4c8] sm:$0xff]  ;;  %v618_v21 = vld [vmem:[#allocation8 + $0x278] sm:$0xff] }
  0x9f   :  { %884 = vmatpush.msra.mxu0 %v552_v53  ;;  %842 = vmatpush.msra.mxu1 %v671_v9  ;;  %v628_v9 = vld [vmem:[#allocation8 + $0x2c8] sm:$0xff] }
  0xa0   :  { %907 = vmatpush.msra.mxu2 %v584_v2  ;;  %865 = vmatpush.msra.mxu3 %v703_v24  ;;  %v626_v2 = vld [vmem:[#allocation8 + $0x2b8] sm:$0xff] }
  0xa1   :  { %885 = vmatpush.msra.mxu0 %v550_v57  ;;  %843 = vmatpush.msra.mxu1 %v669_v62  ;;  %v660_v62 = vld [vmem:[#allocation8 + $0x3c8] sm:$0xff] }
  0xa2   :  { %908 = vmatpush.msra.mxu2 %v582_v7  ;;  %866 = vmatpush.msra.mxu3 %v701_v25  ;;  %v624_v7 = vld [vmem:[#allocation8 + $0x2a8] sm:$0xff]  ;;  %v730_v25 = vld [vmem:[#allocation8 + $0x5f8] sm:$0xff] }
  0xa3   :  { %886 = vmatpush.msra.mxu0 %v548_v60  ;;  %844 = vmatpush.msra.mxu1 %v667_v3  ;;  %v235_v3 = vperm.slane %v1288_v23, 3 }
  0xa4   :  { %909 = vmatpush.msra.mxu2 %v580_v11  ;;  %867 = vmatpush.msra.mxu3 %v699_v30  ;;  %v650_v30 = vld [vmem:[#allocation8 + $0x378] sm:$0xff] }
  0xa5   :  { %887 = vmatpush.msra.mxu0 %v546_v0 }
  0xa6   :  { %910 = vmatpush.msra.mxu2 %v578_v14 }
  0xa7   :  { %888 = vmatpush.msra.mxu0 %v544_v5  ;;  %v690_v5 = vld [vmem:[#allocation8 + $0x4b8] sm:$0xff] }
  0xa8   :  { %911 = vmatpush.msra.mxu2 %v576_v16  ;;  %v654_v16 = vld [vmem:[#allocation8 + $0x398] sm:$0xff] }
  0xa9   :  { %889 = vmatpush.msra.mxu0 %v542_v10  ;;  %v656_v10 = vld [vmem:[#allocation8 + $0x3a8] sm:$0xff] }
  0xaa   :  { %912 = vmatpush.msra.mxu2 %v574_v19 }
  0xab   :  { %890 = vmatpush.msra.mxu0 %v540_v13 }
  0xac   :  { %913 = vmatpush.msra.mxu2 %v572_v22 }
  0xb2   :  { %v291_v1 = vpop.f32.mrf.mxu1 }
  0xb4   :  { %v337_v6 = vpop.f32.mrf.mxu3 }
  0xbb   :  { %v294_v17 = vpop.f32.mrf.mxu1 }
  0xbd   :  { %v340_v20 = vpop.f32.mrf.mxu3 }
  0xc5   :  { %v268_v31 = vpop.f32.mrf.mxu0  ;;  %v360_v32 = vpop.f32.mrf.mxu1 }
  0xc6   :  { %v269_v33 = vadd.f32 %v268_v31, %v232_v27  ;;  %v361_v34 = vadd.f32 %v360_v32, %v234_v28  ;;  %v314_v35 = vpop.f32.mrf.mxu2  ;;  %v383_v36 = vpop.f32.mrf.mxu3  ;;  %v728_v31 = vld [vmem:[#allocation8 + $0x5e8] sm:$0xff]  ;;  %v682_v32 = vld [vmem:[#allocation8 + $0x478] sm:$0xff] }
  0xc7   :  { %v315_v37 = vadd.f32 %v314_v35, %v233_v29  ;;  %v614_v35 = vld [vmem:[#allocation8 + $0x258] sm:$0xff] }
  0xc8   :  { %v1293_v38 = vadd.f32 %v291_v1, %v269_v33  ;;  %v1295_v39 = vadd.f32 %v383_v36, %v361_v34  ;;  %v648_v36 = vld [vmem:[#allocation8 + $0x368] sm:$0xff] }
  0xc9   :  { %v1297_v40 = vadd.f32 %v337_v6, %v315_v37  ;;  %v658_v6 = vld [vmem:[#allocation8 + $0x3b8] sm:$0xff] }
  0xca   :  { %v527_v41 = vmax.f32 %v1293_v38, 0.0  ;;  %v529_v43 = vmax.f32 %v1295_v39, 0.0  ;;  %v726_v38 = vld [vmem:[#allocation8 + $0x5d8] sm:$0xff] }
  0xcb   :  { %v528_v44 = vmax.f32 %v1297_v40, 0.0  ;;  %v706_v40 = vld [vmem:[#allocation8 + $0x538] sm:$0xff] }
  0xcc   :  { %799 = vmatmul.f32.vlgmr.msrb.gmra.mxu0 %v529_v43  ;;  %753 = vmatmul.f32.vlgmr.msrb.gmra.mxu1 %v527_v41 }
  0xcd   :  { %776 = vmatmul.f32.vlgmr.msrb.gmra.mxu3 %v528_v44  ;;  %921 = vmatpush.msrb.mxu1 %v634_v26 }
  0xce   :  { %v271_v49 = vpop.f32.mrf.mxu0  ;;  %v363_v50 = vpop.f32.mrf.mxu1  ;;  %967 = vmatpush.msrb.mxu0 %v698_v45  ;;  %944 = vmatpush.msrb.mxu3 %v666_v56  ;;  %v646_v56 = vld [vmem:[#allocation8 + $0x358] sm:$0xff] }
  0xcf   :  { %v272_v52 = vadd.f32 %v271_v49, %v232_v27  ;;  %v364_v53 = vadd.f32 %v363_v50, %v234_v28  ;;  %v317_v54 = vpop.f32.mrf.mxu2  ;;  %922 = vmatpush.msrb.mxu1 %v632_v46  ;;  %v684_v27 = vld [vmem:[#allocation8 + $0x488] sm:$0xff] }
  0xd0   :  { %v318_v57 = vadd.f32 %v317_v54, %v233_v29  ;;  %v386_v58 = vpop.f32.mrf.mxu3  ;;  %968 = vmatpush.msrb.mxu0 %v696_v47  ;;  %945 = vmatpush.msrb.mxu3 %v664_v48  ;;  %v616_v29 = vld [vmem:[#allocation8 + $0x268] sm:$0xff] }
  0xd1   :  { %v1308_v59 = vadd.f32 %v386_v58, %v364_v53  ;;  %923 = vmatpush.msrb.mxu1 %v630_v51  ;;  %v1310_v60 = vadd.f32 %v294_v17, %v272_v52  ;;  %v236_v17 = vperm.slane %v1288_v23, 4  ;;  %v724_v48 = vld [vmem:[#allocation8 + $0x5c8] sm:$0xff]  ;;  %v722_v52 = vld [vmem:[#allocation8 + $0x5b8] sm:$0xff] }
  0xd2   :  { %v1312_v63 = vadd.f32 %v340_v20, %v318_v57  ;;  %969 = vmatpush.msrb.mxu0 %v694_v42  ;;  %946 = vmatpush.msrb.mxu3 %v662_v55  ;;  %v652_v20 = vld [vmem:[#allocation8 + $0x388] sm:$0xff]  ;;  %v678_v53 = vld [vmem:[#allocation8 + $0x458] sm:$0xff] }
  0xd3   :  { %v535_v0 = vmax.f32 %v1308_v59, 0.0  ;;  %924 = vmatpush.msrb.mxu1 %v628_v9  ;;  %v533_v1 = vmax.f32 %v1310_v60, 0.0  ;;  %v612_v49 = vld [vmem:[#allocation8 + $0x248] sm:$0xff]  ;;  %v610_v42 = vld [vmem:[#allocation8 + $0x238] sm:$0xff] }
  0xd4   :  { %v534_v4 = vmax.f32 %v1312_v63, 0.0  ;;  %970 = vmatpush.msrb.mxu0 %v692_v61  ;;  %947 = vmatpush.msrb.mxu3 %v660_v62  ;;  %v644_v55 = vld [vmem:[#allocation8 + $0x348] sm:$0xff]  ;;  %v642_v62 = vld [vmem:[#allocation8 + $0x338] sm:$0xff] }
  0xd5   :  { %802 = vmatmul.f32.gmra.mxu0 %v535_v0  ;;  %756 = vmatmul.f32.gmra.mxu1 %v533_v1  ;;  %v720_v57 = vld [vmem:[#allocation8 + $0x5a8] sm:$0xff]  ;;  %v731_v63 = vld [vmem:[%s1372_s4] sm:$0x3]  ;;  %s1195_s4 = smov [#allocation10]  }
  0xd6   :  { %779 = vmatmul.f32.gmra.mxu3 %v534_v4  ;;  %925 = vmatpush.msrb.mxu1 %v626_v2  ;;  %v676_v58 = vld [vmem:[#allocation8 + $0x448] sm:$0xff]  ;;  %s1021_s15 = sshll.u32 %s1195_s4, 4  ;;  %s1022_s15 = int_to_ptr.vmem [resolvable:$true] %s1021_s15 }
  0xd7   :  { %v406_v11 = vpop.f32.mrf.mxu0  ;;  %971 = vmatpush.msrb.mxu0 %v690_v5  ;;  %948 = vmatpush.msrb.mxu3 %v658_v6  ;;  %v608_v61 = vld [vmem:[#allocation8 + $0x228] sm:$0xff]  ;;  %v674_v5 = vld [vmem:[#allocation8 + $0x438] sm:$0xff]  ;;  %v237_v6 = vperm.slane %v1288_v23, 5 }
  0xd8   :  { %v407_v13 = vadd.f32 %v406_v11, %v235_v3  ;;  %v429_v14 = vpop.f32.mrf.mxu2  ;;  %926 = vmatpush.msrb.mxu1 %v624_v7  ;;  %v640_v60 = vld [vmem:[#allocation8 + $0x328] sm:$0xff] }
  0xd9   :  { %972 = vmatpush.msrb.mxu0 %v688_v8  ;;  %949 = vmatpush.msrb.mxu3 %v656_v10  ;;  %v716_v7 = vld [vmem:[#allocation8 + $0x588] sm:$0xff]  ;;  %v606_v8 = vld [vmem:[#allocation8 + $0x218] sm:$0xff] }
  0xda   :  { %v1325_v19 = vadd.f32 %v429_v14, %v407_v13  ;;  %927 = vmatpush.msrb.mxu1 %v622_v12  ;;  %v672_v11 = vld [vmem:[#allocation8 + $0x428] sm:$0xff]  ;;  %v714_v12 = vld [vmem:[#allocation8 + $0x578] sm:$0xff] }
  0xdb   :  { %973 = vmatpush.msrb.mxu0 %v686_v15  ;;  %950 = vmatpush.msrb.mxu3 %v654_v16  ;;  %v604_v13 = vld [vmem:[#allocation8 + $0x208] sm:$0xff]  ;;  %v670_v15 = vld [vmem:[#allocation8 + $0x418] sm:$0xff] }
  0xdc   :  { %v530_v22 = vmax.f32 %v1325_v19, 0.0  ;;  %v452_v24 = vpop.f32.mrf.mxu3  ;;  %928 = vmatpush.msrb.mxu1 %v620_v18  ;;  %v638_v16 = vld [vmem:[#allocation8 + $0x318] sm:$0xff]  ;;  %v712_v23 = vld [vmem:[#allocation8 + $0x568] sm:$0xff] }
  0xdd   :  { %v453_v28 = vadd.f32 %v452_v24, %v236_v17  ;;  %891 = vmatmul.f32.vlgmr.msra.gmra.mxu0 %v527_v41  ;;  %951 = vmatpush.msrb.mxu3 %v652_v20  ;;  %v680_v41 = vld [vmem:[#allocation8 + $0x468] sm:$0xff]  ;;  %v710_v24 = vld [vmem:[#allocation8 + $0x558] sm:$0xff] }
  0xde   :  { %822 = vmatmul.f32.vlgmr.msrb.gmra.mxu2 %v530_v22  ;;  %929 = vmatpush.msrb.mxu1 %v618_v21  ;;  %v668_v18 = vld [vmem:[#allocation8 + $0x408] sm:$0xff] }
  0xdf   :  { %v475_v33 = vpop.f32.mrf.mxu1  ;;  %v409_v34 = vpop.f32.mrf.mxu0  ;;  %990 = vmatpush.msrb.mxu2 %v730_v25  ;;  %974 = vmatpush.msrb.mxu0 %v684_v27  ;;  %v636_v20 = vld [vmem:[#allocation8 + $0x308] sm:$0xff] }
  0xe0   :  { %v1332_v37 = vadd.f32 %v475_v33, %v453_v28  ;;  %v410_v26 = vadd.f32 %v409_v34, %v235_v3  ;;  %930 = vmatpush.msrb.mxu1 %v616_v29  ;;  %952 = vmatpush.msrb.mxu3 %v650_v30  ;;  %v718_v3 = vld [vmem:[#allocation8 + $0x598] sm:$0xff]  ;;  %v708_v27 = vld [vmem:[#allocation8 + $0x548] sm:$0xff] }
  0xe1   :  { %v432_v45 = vpop.f32.mrf.mxu2  ;;  %991 = vmatpush.msrb.mxu2 %v728_v31  ;;  %975 = vmatpush.msrb.mxu0 %v682_v32  ;;  %v704_v30 = vld [vmem:[#allocation8 + $0x528] sm:$0xff]  ;;  %v702_v32 = vld [vmem:[#allocation8 + $0x518] sm:$0xff] }
  0xe2   :  { %v531_v46 = vmax.f32 %v1332_v37, 0.0  ;;  %v1335_v47 = vadd.f32 %v432_v45, %v410_v26  ;;  %931 = vmatpush.msrb.mxu1 %v614_v35  ;;  %953 = vmatpush.msrb.mxu3 %v648_v36  ;;  %v700_v34 = vld [vmem:[#allocation8 + $0x508] sm:$0xff]  ;;  %v733_v35 = vperm.slane %v731_v63, 0 }
  0xe3   :  { %992 = vmatpush.msrb.mxu2 %v726_v38  ;;  %976 = vmatpush.msrb.mxu0 %v680_v41 }
  0xe4   :  { %v536_v50 = vmax.f32 %v1335_v47, 0.0  ;;  %845 = vmatmul.f32.vlgmr.msra.gmra.mxu1 %v531_v46  ;;  %v455_v51 = vpop.f32.mrf.mxu3  ;;  %954 = vmatpush.msrb.mxu3 %v646_v56 }
  0xe5   :  { %v456_v54 = vadd.f32 %v455_v51, %v236_v17  ;;  %993 = vmatpush.msrb.mxu2 %v724_v48  ;;  %894 = vmatmul.f32.gmra.mxu0 %v533_v1 }
  0xe6   :  { %825 = vmatmul.f32.gmra.mxu2 %v536_v50  ;;  %932 = vmatpush.msrb.mxu1 %v612_v49 }
  0xe7   :  { %v478_v9 = vpop.f32.mrf.mxu1  ;;  %994 = vmatpush.msrb.mxu2 %v722_v52  ;;  %977 = vmatpush.msrb.mxu0 %v678_v53 }
  0xe8   :  { %v479_v2 = vadd.f32 %v478_v9, %v456_v54  ;;  %933 = vmatpush.msrb.mxu1 %v610_v42  ;;  %955 = vmatpush.msrb.mxu3 %v644_v55  ;;  %v734_v42 = vperm.slane %v731_v63, 1 }
  0xe9   :  { %995 = vmatpush.msrb.mxu2 %v720_v57  ;;  %978 = vmatpush.msrb.mxu0 %v676_v58  ;;  %v521_v10 = vpop.f32.mrf.mxu0 }
  0xea   :  { %v537_v1 = vmax.f32 %v479_v2, 0.0  ;;  %934 = vmatpush.msrb.mxu1 %v608_v61  ;;  %956 = vmatpush.msrb.mxu3 %v642_v62 }
  0xeb   :  { %996 = vmatpush.msrb.mxu2 %v718_v3  ;;  %979 = vmatpush.msrb.mxu0 %v674_v5 }
  0xec   :  { %848 = vmatmul.f32.gmra.mxu1 %v537_v1  ;;  %957 = vmatpush.msrb.mxu3 %v640_v60 }
  0xed   :  { %v498_v14 = vpop.f32.mrf.mxu2  ;;  %997 = vmatpush.msrb.mxu2 %v716_v7  ;;  %935 = vmatpush.msrb.mxu1 %v606_v8 }
  0xee   :  { %v499_v17 = vadd.f32 %v498_v14, %v237_v6  ;;  %914 = vmatmul.f32.vlgmr.msra.gmra.mxu2 %v528_v44  ;;  %980 = vmatpush.msrb.mxu0 %v672_v11 }
  0xef   :  { %998 = vmatpush.msrb.mxu2 %v714_v12  ;;  %936 = vmatpush.msrb.mxu1 %v604_v13 }
  0xf0   :  { %v522_v21 = vadd.f32 %v521_v10, %v499_v17  ;;  %981 = vmatpush.msrb.mxu0 %v670_v15  ;;  %958 = vmatpush.msrb.mxu3 %v638_v16 }
  0xf1   :  { %999 = vmatpush.msrb.mxu2 %v712_v23  ;;  %v524_v28 = vpop.f32.mrf.mxu0 }
  0xf2   :  { %v532_v25 = vmax.f32 %v522_v21, 0.0  ;;  %982 = vmatpush.msrb.mxu0 %v668_v18  ;;  %959 = vmatpush.msrb.mxu3 %v636_v20 }
  0xf3   :  { %1000 = vmatpush.msrb.mxu2 %v710_v24  ;;  %983 = vmatmul.f32.vlgmr.msrb.gmra.mxu0 %v531_v46 }
  0xf4   :  { %868 = vmatmul.f32.vlgmr.msra.gmra.mxu3 %v532_v25  ;;  %937 = vmatmul.f32.vlgmr.msrb.gmra.mxu1 %v529_v43 }
  0xf5   :  { %v501_v44 = vpop.f32.mrf.mxu2  ;;  %1001 = vmatpush.msrb.mxu2 %v708_v27 }
  0xf6   :  { %v502_v29 = vadd.f32 %v501_v44, %v237_v6  ;;  %917 = vmatmul.f32.gmra.mxu2 %v534_v4 }
  0xf7   :  { %1002 = vmatpush.msrb.mxu2 %v706_v40 }
  0xf8   :  { %v525_v31 = vadd.f32 %v524_v28, %v502_v29 }
  0xf9   :  { %1003 = vmatpush.msrb.mxu2 %v704_v30 }
  0xfa   :  { %v538_v33 = vmax.f32 %v525_v31, 0.0 }
  0xfb   :  { %1004 = vmatpush.msrb.mxu2 %v702_v32  ;;  %986 = vmatmul.f32.gmra.mxu0 %v537_v1 }
  0xfc   :  { %871 = vmatmul.f32.gmra.mxu3 %v538_v33  ;;  %940 = vmatmul.f32.gmra.mxu1 %v535_v0 }
  0xfd   :  { %1005 = vmatpush.msrb.mxu2 %v700_v34 }
  0xfe   :  { %1006 = vmatmul.f32.vlgmr.msrb.gmra.mxu2 %v532_v25 }
 0x104   :  { %960 = vmatmul.f32.vlgmr.msrb.gmra.mxu3 %v530_v22 }
 0x106   :  { %1009 = vmatmul.f32.gmra.mxu2 %v538_v33 }
 0x10c   :  { %963 = vmatmul.f32.gmra.mxu3 %v536_v50 }
 0x149   :  { %v754_v39 = vpop.f32.mrf.mxu1  ;;  %v800_v43 = vpop.f32.mrf.mxu0 }
 0x14a   :  { %v755_v0 = vadd.f32 %v754_v39, %v733_v35 }
 0x150   :  { %v777_v36 = vpop.f32.mrf.mxu3 }
 0x151   :  { %v778_v38 = vadd.f32 %v777_v36, %v755_v0 }
 0x152   :  { %v757_v59 = vpop.f32.mrf.mxu1  ;;  %v803_v37 = vpop.f32.mrf.mxu0 }
 0x153   :  { %v758_v41 = vadd.f32 %v757_v59, %v733_v35  ;;  %v801_v45 = vadd.f32 %v800_v43, %v778_v38 }
 0x159   :  { %v780_v19 = vpop.f32.mrf.mxu3 }
 0x15a   :  { %v892_v46 = vpop.f32.mrf.mxu0  ;;  %v781_v47 = vadd.f32 %v780_v19, %v758_v41 }
 0x15b   :  { %v893_v61 = vadd.f32 %v892_v46, %v734_v42 }
 0x15c   :  { %v804_v51 = vadd.f32 %v803_v37, %v781_v47 }
 0x161   :  { %v823_v4 = vpop.f32.mrf.mxu2  ;;  %v846_v22 = vpop.f32.mrf.mxu1 }
 0x162   :  { %v824_v56 = vadd.f32 %v823_v4, %v801_v45  ;;  %v895_v55 = vpop.f32.mrf.mxu0 }
 0x163   :  { %v896_v6 = vadd.f32 %v895_v55, %v734_v42 }
 0x164   :  { %v847_v49 = vadd.f32 %v846_v22, %v824_v56 }
 0x169   :  { %v826_v26 = vpop.f32.mrf.mxu2  ;;  %v849_v53 = vpop.f32.mrf.mxu1 }
 0x16a   :  { %v827_v54 = vadd.f32 %v826_v26, %v804_v51 }
 0x16c   :  { %v850_v57 = vadd.f32 %v849_v53, %v827_v54 }
 0x170   :  { %v984_v60 = vpop.f32.mrf.mxu0 }
 0x171   :  { %v915_v48 = vpop.f32.mrf.mxu2  ;;  %v938_v3 = vpop.f32.mrf.mxu1 }
 0x172   :  { %v916_v2 = vadd.f32 %v915_v48, %v893_v61 }
 0x174   :  { %v939_v5 = vadd.f32 %v938_v3, %v916_v2 }
 0x177   :  { %v869_v50 = vpop.f32.mrf.mxu3 }
 0x178   :  { %v870_v52 = vadd.f32 %v869_v50, %v847_v49  ;;  %v987_v17 = vpop.f32.mrf.mxu0 }
 0x179   :  { %v918_v58 = vpop.f32.mrf.mxu2  ;;  %v941_v13 = vpop.f32.mrf.mxu1 }
 0x17a   :  { %1013 = vst [vmem:[#allocation10] sm:$0xff] %v870_v52  ;;  %v919_v10 = vadd.f32 %v918_v58, %v896_v6 }
 0x17c   :  { %v942_v14 = vadd.f32 %v941_v13, %v919_v10 }
 0x17f   :  { %v872_v9 = vpop.f32.mrf.mxu3 }
 0x180   :  { %v873_v62 = vadd.f32 %v872_v9, %v850_v57 }
 0x181   :  { %v1007_v8 = vpop.f32.mrf.mxu2 }
 0x182   :  { %1015 = vst [vmem:[#allocation10 + $0x10] sm:$0xff] %v873_v62 }
 0x187   :  { %v961_v1 = vpop.f32.mrf.mxu3 }
 0x188   :  { %v962_v7 = vadd.f32 %v961_v1, %v939_v5 }
 0x189   :  { %v1010_v18 = vpop.f32.mrf.mxu2 }
 0x18a   :  { %v985_v11 = vadd.f32 %v984_v60, %v962_v7 }
 0x18c   :  { %v1008_v12 = vadd.f32 %v1007_v8, %v985_v11 }
 0x18e   :  { %1014 = vst [vmem:[#allocation10 + $0x8] sm:$0xff] %v1008_v12 }
 0x18f   :  { %v964_v15 = vpop.f32.mrf.mxu3 }
 0x190   :  { %v965_v16 = vadd.f32 %v964_v15, %v942_v14 }
 0x192   :  { %v988_v23 = vadd.f32 %v987_v17, %v965_v16 }
 0x194   :  { %v1011_v20 = vadd.f32 %v1010_v18, %v988_v23 }
 0x196   :  { %1016 = vst [vmem:[#allocation10 + $0x18] sm:$0xff] %v1011_v20 }
 0x197   :  { %1029 = dma.vmem_to_hbm [thread:$0]  %s1022_s15, 512, %s1024_s18, [#allocation4], %s1191_s30, %s1191_s30, %s1192_s6  }
 0x198   :  { %1185 = dma.done.wait [#allocation4], 512  }
 0x199   :  { %1186 = vsyncadd [#allocation4], 4294966784 }
 0x19a   :  { %1034 = vsyncpa [#allocation3], 1 }
 0x19b   :  { %1035 = vsyncpa [#allocation6], 1 }
 0x19c   :  { %1036 = vsyncpa [#allocation9], 1 }
 0x19d   :  { %1037 = vsyncpa [#allocation4], 1 }

// kernel: tpu_custom_call.1
= control target key start
LH: loop header
LB: loop body
LE: loop exit
PB: predicated region body
PF: predicated region fallthrough
CT: control target
= control target key end

     0   :  { %10 = vsyncpa [#allocation3], 0  ;;  %s1368_s0 = inlined_call_operand.hbm [shape: f32[16,192], index: 0, kind: input, shape index: {}]   ;;  %s1369_s1 = inlined_call_operand.hbm [shape: f32[192,768], index: 1, kind: input, shape index: {}]   ;;  %s1370_s2 = inlined_call_operand.hbm [shape: f32[1,768], index: 2, kind: input, shape index: {}]   ;;  %s1371_s3 = inlined_call_operand.hbm [shape: f32[768,256], index: 3, kind: input, shape index: {}]   ;;  %s1372_s4 = inlined_call_operand.vmem [shape: f32[1,256], index: 4, kind: input, shape index: {}]   ;;  %s1373_s5 = inlined_call_operand.hbm [shape: f32[16,256], index: 5, kind: output, shape index: {}]  }
   0x1   :  { %11 = vsyncpa [#allocation6], 0 }
   0x2   :  { %12 = vsyncpa [#allocation9], 0  ;;  %s31_s20 = sshll.u32 %s1369_s1, 4  ;;  %s32_s20 = int_to_ptr.hbm [resolvable:$true] %s31_s20 }
   0x3   :  { %13 = vsyncpa [#allocation4], 0  ;;  %s1187_s21 = smov [#allocation5]   ;;  %s18_s25 = sshll.u32 %s1368_s0, 4  ;;  %s19_s25 = int_to_ptr.hbm [resolvable:$true] %s18_s25 }
   0x4   :  { %s33_s22 = sshll.u32 %s1187_s21, 4  ;;  %s1188_s26 = smov 768   ;;  %s34_s22 = int_to_ptr.vmem [resolvable:$true] %s33_s22 }
   0x5   :  { %s1189_s27 = smov 48   ;;  %s1190_s28 = smov [#allocation2]  }
   0x6   :  { %39 = dma.hbm_to_vmem [thread:$0]  %s32_s20, 18432, %s34_s22, [#allocation6], %s1188_s26, %s1188_s26, %s1189_s27  }
   0x7   :  { %s20_s29 = sshll.u32 %s1190_s28, 4  ;;  %s1191_s30 = smov 256   ;;  %s21_s29 = int_to_ptr.vmem [resolvable:$true] %s20_s29 }
   0x8   :  { %s1192_s6 = smov 16   ;;  %s45_s8 = sshll.u32 %s1370_s2, 4  ;;  %s46_s8 = int_to_ptr.hbm [resolvable:$true] %s45_s8 }
   0x9   :  { %26 = dma.hbm_to_vmem [thread:$0]  %s19_s25, 512, %s21_s29, [#allocation3], %s1191_s30, %s1191_s30, %s1192_s6  }
   0xa   :  { %s1193_s9 = smov [#allocation7]   ;;  %s55_s12 = sshll.u32 %s1371_s3, 4  ;;  %s56_s12 = int_to_ptr.hbm [resolvable:$true] %s55_s12 }
   0xb   :  { %s47_s0 = sshll.u32 %s1193_s9, 4  ;;  %s1194_s13 = smov [#allocation8]   ;;  %s48_s0 = int_to_ptr.vmem [resolvable:$true] %s47_s0 }
   0xc   :  { %50 = dma.hbm_to_vmem [thread:$0]  %s46_s8, 96, %s48_s0, [#allocation6]  }
   0xd   :  { %s57_s14 = sshll.u32 %s1194_s13, 4  ;;  %s58_s14 = int_to_ptr.vmem [resolvable:$true] %s57_s14 }
   0xe   :  { %63 = dma.hbm_to_vmem [thread:$0]  %s56_s12, 24576, %s58_s14, [#allocation9], %s1191_s30, %s1191_s30, %s1192_s6  }
   0xf   :  { %1179 = dma.done.wait [#allocation3], 512  }
  0x10   :  { %1180 = vsyncadd [#allocation3], 4294966784 }
  0x11   :  { %1181 = dma.done.wait [#allocation6], 18528  }
  0x12   :  { %1182 = vsyncadd [#allocation6], 4294948768 }
  0x13   :  { %1183 = dma.done.wait [#allocation9], 24576  }
  0x14   :  { %1184 = vsyncadd [#allocation9], 4294942720  ;;  %v176_v0 = vld [vmem:[#allocation5 + $0x2d0] sm:$0xff]  ;;  %v177_v2 = vld [vmem:[#allocation5 + $0x2d8] sm:$0xff]  ;;  %vm244_vm0 = vcmask 523264   ;;  %s1023_s18 = sshll.u32 %s1373_s5, 4  ;;  %s1024_s18 = int_to_ptr.hbm [resolvable:$true] %s1023_s18 }
  0x15   :  { %v224_v1 = vld [vmem:[#allocation5 + $0x450] sm:$0xff]  ;;  %251 = vmatpush.msra.mxu0 %v176_v0  ;;  %v225_v3 = vld [vmem:[#allocation5 + $0x458] sm:$0xff]  ;;  %v170_v4 = vld [vmem:[#allocation5 + $0x2a0] sm:$0xff]  ;;  %297 = vmatpush.msra.mxu2 %v177_v2 }
  0x16   :  { %282 = vmatpush.msra.mxu1 %v224_v1  ;;  %v218_v5 = vld [vmem:[#allocation5 + $0x420] sm:$0xff]  ;;  %328 = vmatpush.msra.mxu3 %v225_v3  ;;  %v171_v6 = vld [vmem:[#allocation5 + $0x2a8] sm:$0xff]  ;;  %v164_v8 = vld [vmem:[#allocation5 + $0x270] sm:$0xff] }
  0x17   :  { %v219_v7 = vld [vmem:[#allocation5 + $0x428] sm:$0xff]  ;;  %252 = vmatpush.msra.mxu0 %v170_v4  ;;  %v212_v9 = vld [vmem:[#allocation5 + $0x3f0] sm:$0xff]  ;;  %v165_v10 = vld [vmem:[#allocation5 + $0x278] sm:$0xff]  ;;  %298 = vmatpush.msra.mxu2 %v171_v6 }
  0x18   :  { %283 = vmatpush.msra.mxu1 %v218_v5  ;;  %v213_v11 = vld [vmem:[#allocation5 + $0x3f8] sm:$0xff]  ;;  %329 = vmatpush.msra.mxu3 %v219_v7  ;;  %v158_v12 = vld [vmem:[#allocation5 + $0x240] sm:$0xff]  ;;  %v159_v14 = vld [vmem:[#allocation5 + $0x248] sm:$0xff] }
  0x19   :  { %v206_v13 = vld [vmem:[#allocation5 + $0x3c0] sm:$0xff]  ;;  %253 = vmatpush.msra.mxu0 %v164_v8  ;;  %v207_v15 = vld [vmem:[#allocation5 + $0x3c8] sm:$0xff]  ;;  %299 = vmatpush.msra.mxu2 %v165_v10  ;;  %v152_v16 = vld [vmem:[#allocation5 + $0x210] sm:$0xff] }
  0x1a   :  { %284 = vmatpush.msra.mxu1 %v212_v9  ;;  %330 = vmatpush.msra.mxu3 %v213_v11  ;;  %v200_v17 = vld [vmem:[#allocation5 + $0x390] sm:$0xff]  ;;  %v153_v18 = vld [vmem:[#allocation5 + $0x218] sm:$0xff]  ;;  %v146_v20 = vld [vmem:[#allocation5 + $0x1e0] sm:$0xff] }
  0x1b   :  { %254 = vmatpush.msra.mxu0 %v158_v12  ;;  %v201_v19 = vld [vmem:[#allocation5 + $0x398] sm:$0xff]  ;;  %300 = vmatpush.msra.mxu2 %v159_v14  ;;  %v194_v21 = vld [vmem:[#allocation5 + $0x360] sm:$0xff]  ;;  %v147_v22 = vld [vmem:[#allocation5 + $0x1e8] sm:$0xff] }
  0x1c   :  { %285 = vmatpush.msra.mxu1 %v206_v13  ;;  %331 = vmatpush.msra.mxu3 %v207_v15  ;;  %v195_v23 = vld [vmem:[#allocation5 + $0x368] sm:$0xff]  ;;  %v140_v24 = vld [vmem:[#allocation5 + $0x1b0] sm:$0xff]  ;;  %v141_v26 = vld [vmem:[#allocation5 + $0x1b8] sm:$0xff] }
  0x1d   :  { %255 = vmatpush.msra.mxu0 %v152_v16  ;;  %301 = vmatpush.msra.mxu2 %v153_v18  ;;  %v188_v25 = vld [vmem:[#allocation5 + $0x330] sm:$0xff]  ;;  %v189_v27 = vld [vmem:[#allocation5 + $0x338] sm:$0xff]  ;;  %v134_v28 = vld [vmem:[#allocation5 + $0x180] sm:$0xff] }
  0x1e   :  { %286 = vmatpush.msra.mxu1 %v200_v17  ;;  %332 = vmatpush.msra.mxu3 %v201_v19  ;;  %v182_v29 = vld [vmem:[#allocation5 + $0x300] sm:$0xff]  ;;  %v135_v30 = vld [vmem:[#allocation5 + $0x188] sm:$0xff]  ;;  %v128_v34 = vld [vmem:[#allocation5 + $0x150] sm:$0xff] }
  0x1f   :  { %256 = vmatpush.msra.mxu0 %v146_v20  ;;  %302 = vmatpush.msra.mxu2 %v147_v22  ;;  %v183_v31 = vld [vmem:[#allocation5 + $0x308] sm:$0xff]  ;;  %v178_v32 = vld [vmem:[#allocation5 + $0x2e0] sm:$0xff]  ;;  %v129_v35 = vld [vmem:[#allocation5 + $0x158] sm:$0xff] }
  0x20   :  { %287 = vmatpush.msra.mxu1 %v194_v21  ;;  %333 = vmatpush.msra.mxu3 %v195_v23  ;;  %v226_v33 = vld [vmem:[#allocation5 + $0x460] sm:$0xff]  ;;  %v172_v36 = vld [vmem:[#allocation5 + $0x2b0] sm:$0xff]  ;;  %v123_v39 = vld [vmem:[#allocation5 + $0x128] sm:$0xff] }
  0x21   :  { %257 = vmatpush.msra.mxu0 %v140_v24  ;;  %303 = vmatpush.msra.mxu2 %v141_v26  ;;  %v220_v37 = vld [vmem:[#allocation5 + $0x430] sm:$0xff]  ;;  %v122_v38 = vld [vmem:[#allocation5 + $0x120] sm:$0xff]  ;;  %v117_v43 = vld [vmem:[#allocation5 + $0xf8] sm:$0xff] }
  0x22   :  { %288 = vmatpush.msra.mxu1 %v188_v25  ;;  %334 = vmatpush.msra.mxu3 %v189_v27  ;;  %v166_v40 = vld [vmem:[#allocation5 + $0x280] sm:$0xff]  ;;  %v116_v42 = vld [vmem:[#allocation5 + $0xf0] sm:$0xff]  ;;  %v111_v47 = vld [vmem:[#allocation5 + $0xc8] sm:$0xff] }
  0x23   :  { %258 = vmatpush.msra.mxu0 %v134_v28  ;;  %304 = vmatpush.msra.mxu2 %v135_v30  ;;  %v214_v41 = vld [vmem:[#allocation5 + $0x400] sm:$0xff]  ;;  %v160_v44 = vld [vmem:[#allocation5 + $0x250] sm:$0xff]  ;;  %v105_v51 = vld [vmem:[#allocation5 + $0x98] sm:$0xff] }
  0x24   :  { %289 = vmatpush.msra.mxu1 %v182_v29  ;;  %335 = vmatpush.msra.mxu3 %v183_v31  ;;  %v208_v45 = vld [vmem:[#allocation5 + $0x3d0] sm:$0xff]  ;;  %v110_v46 = vld [vmem:[#allocation5 + $0xc0] sm:$0xff]  ;;  %v99_v55 = vld [vmem:[#allocation5 + $0x68] sm:$0xff] }
  0x25   :  { %259 = vmatpush.msra.mxu0 %v128_v34  ;;  %305 = vmatpush.msra.mxu2 %v129_v35  ;;  %v154_v48 = vld [vmem:[#allocation5 + $0x220] sm:$0xff]  ;;  %v104_v50 = vld [vmem:[#allocation5 + $0x90] sm:$0xff]  ;;  %v1244_v56 = vld [vmem:[#allocation2 + $0x8] sm:$0xff] }
  0x26   :  { %343 = vmatpush.msrb.mxu1 %v178_v32  ;;  %374 = vmatpush.msrb.mxu3 %v226_v33  ;;  %v202_v49 = vld [vmem:[#allocation5 + $0x3a0] sm:$0xff]  ;;  %v148_v52 = vld [vmem:[#allocation5 + $0x1f0] sm:$0xff]  ;;  %v93_v60 = vld [vmem:[#allocation5 + $0x38] sm:$0xff] }
  0x27   :  { %260 = vmatpush.msra.mxu0 %v122_v38  ;;  %306 = vmatpush.msra.mxu2 %v123_v39  ;;  %v196_v53 = vld [vmem:[#allocation5 + $0x370] sm:$0xff]  ;;  %v98_v54 = vld [vmem:[#allocation5 + $0x60] sm:$0xff]  ;;  %v87_v0 = vld [vmem:[#allocation5 + $0x8] sm:$0xff] }
  0x28   :  { %344 = vmatpush.msrb.mxu1 %v172_v36  ;;  %375 = vmatpush.msrb.mxu3 %v220_v37  ;;  %v142_v57 = vld [vmem:[#allocation5 + $0x1c0] sm:$0xff]  ;;  %v92_v59 = vld [vmem:[#allocation5 + $0x30] sm:$0xff]  ;;  %v179_v3 = vld [vmem:[#allocation5 + $0x2e8] sm:$0xff] }
  0x29   :  { %261 = vmatpush.msra.mxu0 %v116_v42  ;;  %307 = vmatpush.msra.mxu2 %v117_v43  ;;  %v190_v58 = vld [vmem:[#allocation5 + $0x340] sm:$0xff]  ;;  %v136_v61 = vld [vmem:[#allocation5 + $0x190] sm:$0xff]  ;;  %v227_v4 = vld [vmem:[#allocation5 + $0x468] sm:$0xff] }
  0x2a   :  { %345 = vmatpush.msrb.mxu1 %v166_v40  ;;  %376 = vmatpush.msrb.mxu3 %v214_v41  ;;  %v184_v62 = vld [vmem:[#allocation5 + $0x310] sm:$0xff]  ;;  %v86_v63 = vld [vmem:[#allocation5] sm:$0xff]  ;;  %v173_v7 = vld [vmem:[#allocation5 + $0x2b8] sm:$0xff] }
  0x2b   :  { %262 = vmatpush.msra.mxu0 %v110_v46  ;;  %308 = vmatpush.msra.mxu2 %v111_v47  ;;  %v180_v1 = vld [vmem:[#allocation5 + $0x2f0] sm:$0xff]  ;;  %v130_v2 = vld [vmem:[#allocation5 + $0x160] sm:$0xff]  ;;  %v221_v8 = vld [vmem:[#allocation5 + $0x438] sm:$0xff] }
  0x2c   :  { %346 = vmatpush.msrb.mxu1 %v160_v44  ;;  %377 = vmatpush.msrb.mxu3 %v208_v45  ;;  %v174_v5 = vld [vmem:[#allocation5 + $0x2c0] sm:$0xff]  ;;  %v124_v6 = vld [vmem:[#allocation5 + $0x130] sm:$0xff]  ;;  %v1250_v9 = vld [vmem:[#allocation2 + $0x18] sm:$0xff] }
  0x2d   :  { %263 = vmatpush.msra.mxu0 %v104_v50  ;;  %309 = vmatpush.msra.mxu2 %v105_v51  ;;  %v118_v10 = vld [vmem:[#allocation5 + $0x100] sm:$0xff]  ;;  %v168_v11 = vld [vmem:[#allocation5 + $0x290] sm:$0xff]  ;;  %v167_v12 = vld [vmem:[#allocation5 + $0x288] sm:$0xff] }
  0x2e   :  { %347 = vmatpush.msrb.mxu1 %v154_v48  ;;  %378 = vmatpush.msrb.mxu3 %v202_v49  ;;  %v215_v13 = vld [vmem:[#allocation5 + $0x408] sm:$0xff]  ;;  %v112_v14 = vld [vmem:[#allocation5 + $0xd0] sm:$0xff]  ;;  %v162_v15 = vld [vmem:[#allocation5 + $0x260] sm:$0xff] }
  0x2f   :  { %264 = vmatpush.msra.mxu0 %v98_v54  ;;  %310 = vmatpush.msra.mxu2 %v99_v55  ;;  %v161_v16 = vld [vmem:[#allocation5 + $0x258] sm:$0xff]  ;;  %v156_v18 = vld [vmem:[#allocation5 + $0x230] sm:$0xff]  ;;  %v106_v19 = vld [vmem:[#allocation5 + $0xa0] sm:$0xff] }
  0x30   :  { %348 = vmatpush.msrb.mxu1 %v148_v52  ;;  %379 = vmatpush.msrb.mxu3 %v196_v53  ;;  %v209_v17 = vld [vmem:[#allocation5 + $0x3d8] sm:$0xff]  ;;  %v155_v20 = vld [vmem:[#allocation5 + $0x228] sm:$0xff]  ;;  %v150_v22 = vld [vmem:[#allocation5 + $0x200] sm:$0xff] }
  0x31   :  { %1040 = vmatmul.msk.f32.vlgmr.msra.gmra.mxu3 %vm244_vm0, %v1244_v56  ;;  %265 = vmatpush.msra.mxu0 %v92_v59  ;;  %v203_v21 = vld [vmem:[#allocation5 + $0x3a8] sm:$0xff]  ;;  %v100_v23 = vld [vmem:[#allocation5 + $0x70] sm:$0xff]  ;;  %v149_v24 = vld [vmem:[#allocation5 + $0x1f8] sm:$0xff] }
  0x32   :  { %349 = vmatpush.msrb.mxu1 %v142_v57  ;;  %380 = vmatpush.msrb.mxu3 %v190_v58  ;;  %v197_v25 = vld [vmem:[#allocation5 + $0x378] sm:$0xff]  ;;  %v1256_v26 = vld [vmem:[#allocation2] sm:$0xff]  ;;  %v144_v27 = vld [vmem:[#allocation5 + $0x1d0] sm:$0xff] }
  0x33   :  { %311 = vmatpush.msra.mxu2 %v93_v60  ;;  %266 = vmatpush.msra.mxu0 %v86_v63  ;;  %v94_v28 = vld [vmem:[#allocation5 + $0x40] sm:$0xff]  ;;  %v143_v29 = vld [vmem:[#allocation5 + $0x1c8] sm:$0xff]  ;;  %v88_v32 = vld [vmem:[#allocation5 + $0x10] sm:$0xff] }
  0x34   :  { %350 = vmatpush.msrb.mxu1 %v136_v61  ;;  %381 = vmatpush.msrb.mxu3 %v184_v62  ;;  %v191_v30 = vld [vmem:[#allocation5 + $0x348] sm:$0xff]  ;;  %v138_v31 = vld [vmem:[#allocation5 + $0x1a0] sm:$0xff]  ;;  %v137_v33 = vld [vmem:[#allocation5 + $0x198] sm:$0xff] }
  0x35   :  { %1038 = vmatmul.msk.f32.vlgmr.msra.gmra.mxu1 %vm244_vm0, %v1244_v56  ;;  %312 = vmatpush.msra.mxu2 %v87_v0  ;;  %v185_v34 = vld [vmem:[#allocation5 + $0x318] sm:$0xff]  ;;  %v132_v35 = vld [vmem:[#allocation5 + $0x170] sm:$0xff]  ;;  %v131_v37 = vld [vmem:[#allocation5 + $0x168] sm:$0xff] }
  0x36   :  { %435 = vmatpush.msra.mxu3 %v180_v1  ;;  %351 = vmatpush.msrb.mxu1 %v130_v2  ;;  %v181_v36 = vld [vmem:[#allocation5 + $0x2f8] sm:$0xff]  ;;  %v228_v38 = vld [vmem:[#allocation5 + $0x470] sm:$0xff]  ;;  %v126_v39 = vld [vmem:[#allocation5 + $0x140] sm:$0xff] }
  0x37   :  { %389 = vmatpush.msrb.mxu0 %v179_v3  ;;  %420 = vmatpush.msrb.mxu2 %v227_v4  ;;  %v175_v40 = vld [vmem:[#allocation5 + $0x2c8] sm:$0xff]  ;;  %v125_v41 = vld [vmem:[#allocation5 + $0x138] sm:$0xff]  ;;  %v1263_v42 = vld [vmem:[#allocation2 + $0x10] sm:$0xff] }
  0x38   :  { %436 = vmatpush.msra.mxu3 %v174_v5  ;;  %352 = vmatpush.msrb.mxu1 %v124_v6  ;;  %v169_v43 = vld [vmem:[#allocation5 + $0x298] sm:$0xff]  ;;  %v120_v44 = vld [vmem:[#allocation5 + $0x110] sm:$0xff]  ;;  %v119_v45 = vld [vmem:[#allocation5 + $0x108] sm:$0xff] }
  0x39   :  { %390 = vmatpush.msrb.mxu0 %v173_v7  ;;  %421 = vmatpush.msrb.mxu2 %v221_v8  ;;  %v163_v46 = vld [vmem:[#allocation5 + $0x268] sm:$0xff]  ;;  %v222_v47 = vld [vmem:[#allocation5 + $0x440] sm:$0xff]  ;;  %v113_v49 = vld [vmem:[#allocation5 + $0xd8] sm:$0xff] }
  0x3a   :  { %1041 = vmatmul.msk.f32.gmra.mxu3 %vm244_vm0, %v1250_v9  ;;  %353 = vmatpush.msrb.mxu1 %v118_v10  ;;  %v114_v48 = vld [vmem:[#allocation5 + $0xe0] sm:$0xff]  ;;  %v108_v50 = vld [vmem:[#allocation5 + $0xb0] sm:$0xff]  ;;  %v157_v51 = vld [vmem:[#allocation5 + $0x238] sm:$0xff] }
  0x3b   :  { %437 = vmatpush.msra.mxu3 %v168_v11  ;;  %391 = vmatpush.msrb.mxu0 %v167_v12  ;;  %v107_v52 = vld [vmem:[#allocation5 + $0xa8] sm:$0xff]  ;;  %v216_v53 = vld [vmem:[#allocation5 + $0x410] sm:$0xff]  ;;  %v102_v54 = vld [vmem:[#allocation5 + $0x80] sm:$0xff] }
  0x3c   :  { %422 = vmatpush.msrb.mxu2 %v215_v13  ;;  %354 = vmatpush.msrb.mxu1 %v112_v14  ;;  %v151_v55 = vld [vmem:[#allocation5 + $0x208] sm:$0xff]  ;;  %v101_v57 = vld [vmem:[#allocation5 + $0x78] sm:$0xff]  ;;  %v96_v58 = vld [vmem:[#allocation5 + $0x50] sm:$0xff] }
  0x3d   :  { %438 = vmatpush.msra.mxu3 %v162_v15  ;;  %392 = vmatpush.msrb.mxu0 %v161_v16  ;;  %v145_v59 = vld [vmem:[#allocation5 + $0x1d8] sm:$0xff]  ;;  %v95_v60 = vld [vmem:[#allocation5 + $0x48] sm:$0xff]  ;;  %v210_v61 = vld [vmem:[#allocation5 + $0x3e0] sm:$0xff] }
  0x3e   :  { %423 = vmatpush.msrb.mxu2 %v209_v17  ;;  %1039 = vmatmul.msk.f32.gmra.mxu1 %vm244_vm0, %v1250_v9  ;;  %v90_v62 = vld [vmem:[#allocation5 + $0x20] sm:$0xff]  ;;  %v139_v63 = vld [vmem:[#allocation5 + $0x1a8] sm:$0xff]  ;;  %v89_v0 = vld [vmem:[#allocation5 + $0x18] sm:$0xff] }
  0x3f   :  { %439 = vmatpush.msra.mxu3 %v156_v18  ;;  %355 = vmatpush.msrb.mxu1 %v106_v19  ;;  %v204_v1 = vld [vmem:[#allocation5 + $0x3b0] sm:$0xff]  ;;  %v133_v2 = vld [vmem:[#allocation5 + $0x178] sm:$0xff]  ;;  %v198_v4 = vld [vmem:[#allocation5 + $0x380] sm:$0xff] }
  0x40   :  { %393 = vmatpush.msrb.mxu0 %v155_v20  ;;  %424 = vmatpush.msrb.mxu2 %v203_v21  ;;  %v229_v3 = vld [vmem:[#allocation5 + $0x478] sm:$0xff]  ;;  %v127_v5 = vld [vmem:[#allocation5 + $0x148] sm:$0xff]  ;;  %v192_v8 = vld [vmem:[#allocation5 + $0x350] sm:$0xff] }
  0x41   :  { %440 = vmatpush.msra.mxu3 %v150_v22  ;;  %356 = vmatpush.msrb.mxu1 %v100_v23  ;;  %v223_v6 = vld [vmem:[#allocation5 + $0x448] sm:$0xff]  ;;  %v601_v7 = vld [vmem:[#allocation8 + $0x1f0] sm:$0xff]  ;;  %v186_v12 = vld [vmem:[#allocation5 + $0x320] sm:$0xff] }
  0x42   :  { %394 = vmatpush.msrb.mxu0 %v149_v24  ;;  %425 = vmatpush.msrb.mxu2 %v197_v25  ;;  %v121_v10 = vld [vmem:[#allocation5 + $0x118] sm:$0xff]  ;;  %v599_v13 = vld [vmem:[#allocation8 + $0x1e0] sm:$0xff] }
  0x43   :  { %313 = vmatmul.f32.vlgmr.msra.gmra.mxu2 %v1256_v26  ;;  %1042 = vmatmul.msk.f32.vlgmr.msrb.gmra.mxu3 %vm244_vm0, %v1244_v56  ;;  %v217_v11 = vld [vmem:[#allocation5 + $0x418] sm:$0xff]  ;;  %v115_v14 = vld [vmem:[#allocation5 + $0xe8] sm:$0xff] }
  0x44   :  { %441 = vmatpush.msra.mxu3 %v144_v27  ;;  %357 = vmatpush.msrb.mxu1 %v94_v28  ;;  %v109_v15 = vld [vmem:[#allocation5 + $0xb8] sm:$0xff]  ;;  %v211_v16 = vld [vmem:[#allocation5 + $0x3e8] sm:$0xff] }
  0x45   :  { %395 = vmatpush.msrb.mxu0 %v143_v29  ;;  %426 = vmatpush.msrb.mxu2 %v191_v30  ;;  %v569_v17 = vld [vmem:[#allocation8 + $0xf0] sm:$0xff]  ;;  %v103_v19 = vld [vmem:[#allocation5 + $0x88] sm:$0xff] }
  0x46   :  { %442 = vmatpush.msra.mxu3 %v138_v31  ;;  %358 = vmatpush.msrb.mxu1 %v88_v32  ;;  %v597_v18 = vld [vmem:[#allocation8 + $0x1d0] sm:$0xff]  ;;  %v567_v21 = vld [vmem:[#allocation8 + $0xe0] sm:$0xff] }
  0x47   :  { %396 = vmatpush.msrb.mxu0 %v137_v33  ;;  %427 = vmatpush.msrb.mxu2 %v185_v34  ;;  %v205_v20 = vld [vmem:[#allocation5 + $0x3b8] sm:$0xff]  ;;  %v595_v22 = vld [vmem:[#allocation8 + $0x1c0] sm:$0xff] }
  0x48   :  { %267 = vmatmul.f32.vlgmr.msra.gmra.mxu0 %v1256_v26  ;;  %359 = vmatmul.f32.vlgmr.msrb.gmra.mxu1 %v1256_v26  ;;  %v97_v23 = vld [vmem:[#allocation5 + $0x58] sm:$0xff]  ;;  %v199_v24 = vld [vmem:[#allocation5 + $0x388] sm:$0xff] }
  0x49   :  { %443 = vmatpush.msra.mxu3 %v132_v35  ;;  %481 = vmatpush.msra.mxu2 %v181_v36  ;;  %v565_v25 = vld [vmem:[#allocation8 + $0xd0] sm:$0xff]  ;;  %v91_v28 = vld [vmem:[#allocation5 + $0x28] sm:$0xff] }
  0x4a   :  { %397 = vmatpush.msrb.mxu0 %v131_v37  ;;  %466 = vmatpush.msra.mxu1 %v228_v38  ;;  %v593_v27 = vld [vmem:[#allocation8 + $0x1b0] sm:$0xff]  ;;  %v187_v30 = vld [vmem:[#allocation5 + $0x328] sm:$0xff] }
  0x4b   :  { %444 = vmatpush.msra.mxu3 %v126_v39  ;;  %482 = vmatpush.msra.mxu2 %v175_v40  ;;  %v193_v29 = vld [vmem:[#allocation5 + $0x358] sm:$0xff]  ;;  %v563_v31 = vld [vmem:[#allocation8 + $0xc0] sm:$0xff] }
  0x4c   :  { %398 = vmatpush.msrb.mxu0 %v125_v41  ;;  %316 = vmatmul.f32.gmra.mxu2 %v1263_v42  ;;  %v665_v32 = vld [vmem:[#allocation8 + $0x3f0] sm:$0xff]  ;;  %v663_v35 = vld [vmem:[#allocation8 + $0x3e0] sm:$0xff] }
  0x4d   :  { %1043 = vmatmul.msk.f32.gmra.mxu3 %vm244_vm0, %v1250_v9  ;;  %483 = vmatpush.msra.mxu2 %v169_v43  ;;  %v633_v33 = vld [vmem:[#allocation8 + $0x2f0] sm:$0xff]  ;;  %v591_v36 = vld [vmem:[#allocation8 + $0x1a0] sm:$0xff] }
  0x4e   :  { %445 = vmatpush.msra.mxu3 %v120_v44  ;;  %399 = vmatpush.msrb.mxu0 %v119_v45  ;;  %v561_v34 = vld [vmem:[#allocation8 + $0xb0] sm:$0xff]  ;;  %v631_v37 = vld [vmem:[#allocation8 + $0x2e0] sm:$0xff] }
  0x4f   :  { %484 = vmatpush.msra.mxu2 %v163_v46  ;;  %467 = vmatpush.msra.mxu1 %v222_v47  ;;  %v559_v38 = vld [vmem:[#allocation8 + $0xa0] sm:$0xff]  ;;  %v661_v39 = vld [vmem:[#allocation8 + $0x3d0] sm:$0xff] }
  0x50   :  { %446 = vmatpush.msra.mxu3 %v114_v48  ;;  %400 = vmatpush.msrb.mxu0 %v113_v49  ;;  %v589_v40 = vld [vmem:[#allocation8 + $0x190] sm:$0xff]  ;;  %v627_v44 = vld [vmem:[#allocation8 + $0x2c0] sm:$0xff] }
  0x51   :  { %270 = vmatmul.f32.gmra.mxu0 %v1263_v42  ;;  %362 = vmatmul.f32.gmra.mxu1 %v1263_v42  ;;  %v629_v41 = vld [vmem:[#allocation8 + $0x2d0] sm:$0xff]  ;;  %v555_v45 = vld [vmem:[#allocation8 + $0x80] sm:$0xff] }
  0x52   :  { %447 = vmatpush.msra.mxu3 %v108_v50  ;;  %485 = vmatpush.msra.mxu2 %v157_v51  ;;  %v557_v43 = vld [vmem:[#allocation8 + $0x90] sm:$0xff]  ;;  %v623_v50 = vld [vmem:[#allocation8 + $0x2a0] sm:$0xff] }
  0x53   :  { %401 = vmatpush.msrb.mxu0 %v107_v52  ;;  %468 = vmatpush.msra.mxu1 %v216_v53  ;;  %v625_v46 = vld [vmem:[#allocation8 + $0x2b0] sm:$0xff]  ;;  %v551_v51 = vld [vmem:[#allocation8 + $0x60] sm:$0xff] }
  0x54   :  { %448 = vmatpush.msra.mxu3 %v102_v54  ;;  %486 = vmatpush.msra.mxu2 %v151_v55  ;;  %v553_v47 = vld [vmem:[#allocation8 + $0x70] sm:$0xff]  ;;  %v655_v52 = vld [vmem:[#allocation8 + $0x3a0] sm:$0xff] }
  0x55   :  { %402 = vmatpush.msrb.mxu0 %v101_v57  ;;  %1044 = vmatmul.msk.f32.vlgmr.msrb.gmra.mxu2 %vm244_vm0, %v1244_v56  ;;  %v657_v48 = vld [vmem:[#allocation8 + $0x3b0] sm:$0xff]  ;;  %v619_v55 = vld [vmem:[#allocation8 + $0x280] sm:$0xff] }
  0x56   :  { %449 = vmatpush.msra.mxu3 %v96_v58  ;;  %487 = vmatpush.msra.mxu2 %v145_v59  ;;  %v585_v49 = vld [vmem:[#allocation8 + $0x170] sm:$0xff]  ;;  %v547_v57 = vld [vmem:[#allocation8 + $0x40] sm:$0xff] }
  0x57   :  { %403 = vmatpush.msrb.mxu0 %v95_v60  ;;  %469 = vmatpush.msra.mxu1 %v210_v61  ;;  %v621_v53 = vld [vmem:[#allocation8 + $0x290] sm:$0xff]  ;;  %v651_v58 = vld [vmem:[#allocation8 + $0x380] sm:$0xff] }
  0x58   :  { %450 = vmatpush.msra.mxu3 %v90_v62  ;;  %488 = vmatpush.msra.mxu2 %v139_v63  ;;  %v549_v54 = vld [vmem:[#allocation8 + $0x50] sm:$0xff]  ;;  %v615_v61 = vld [vmem:[#allocation8 + $0x260] sm:$0xff] }
  0x59   :  { %404 = vmatpush.msrb.mxu0 %v89_v0  ;;  %451 = vmatmul.f32.vlgmr.msra.gmra.mxu3 %v1256_v26  ;;  %v545_v59 = vld [vmem:[#allocation8 + $0x30] sm:$0xff]  ;;  %v543_v62 = vld [vmem:[#allocation8 + $0x20] sm:$0xff] }
  0x5a   :  { %405 = vmatmul.f32.vlgmr.msrb.gmra.mxu0 %v1256_v26  ;;  %470 = vmatpush.msra.mxu1 %v204_v1  ;;  %v649_v60 = vld [vmem:[#allocation8 + $0x370] sm:$0xff]  ;;  %v647_v63 = vld [vmem:[#allocation8 + $0x360] sm:$0xff] }
  0x5b   :  { %489 = vmatpush.msra.mxu2 %v133_v2  ;;  %512 = vmatpush.msra.mxu0 %v229_v3  ;;  %v613_v0 = vld [vmem:[#allocation8 + $0x250] sm:$0xff]  ;;  %v611_v3 = vld [vmem:[#allocation8 + $0x240] sm:$0xff] }
  0x5c   :  { %471 = vmatpush.msra.mxu1 %v198_v4  ;;  %760 = vmatpush.msrb.mxu3 %v601_v7  ;;  %v541_v1 = vld [vmem:[#allocation8 + $0x10] sm:$0xff]  ;;  %v539_v4 = vld [vmem:[#allocation8] sm:$0xff] }
  0x5d   :  { %490 = vmatpush.msra.mxu2 %v127_v5  ;;  %513 = vmatpush.msra.mxu0 %v223_v6  ;;  %v645_v2 = vld [vmem:[#allocation8 + $0x350] sm:$0xff]  ;;  %v607_v7 = vld [vmem:[#allocation8 + $0x220] sm:$0xff] }
  0x5e   :  { %1045 = vmatmul.msk.f32.gmra.mxu2 %vm244_vm0, %v1250_v9  ;;  %472 = vmatpush.msra.mxu1 %v192_v8  ;;  %v697_v5 = vld [vmem:[#allocation8 + $0x4f0] sm:$0xff] }
  0x5f   :  { %491 = vmatpush.msra.mxu2 %v121_v10  ;;  %514 = vmatpush.msra.mxu0 %v217_v11  ;;  %v609_v6 = vld [vmem:[#allocation8 + $0x230] sm:$0xff]  ;;  %v643_v10 = vld [vmem:[#allocation8 + $0x340] sm:$0xff] }
  0x60   :  { %473 = vmatpush.msra.mxu1 %v186_v12  ;;  %761 = vmatpush.msrb.mxu3 %v599_v13  ;;  %v605_v8 = vld [vmem:[#allocation8 + $0x210] sm:$0xff]  ;;  %v695_v11 = vld [vmem:[#allocation8 + $0x4e0] sm:$0xff] }
  0x61   :  { %492 = vmatpush.msra.mxu2 %v115_v14  ;;  %454 = vmatmul.f32.gmra.mxu3 %v1263_v42  ;;  %v583_v12 = vld [vmem:[#allocation8 + $0x160] sm:$0xff]  ;;  %v641_v14 = vld [vmem:[#allocation8 + $0x330] sm:$0xff] }
  0x62   :  { %1046 = vmatmul.msk.f32.vlgmr.msra.gmra.mxu1 %vm244_vm0, %v1244_v56  ;;  %408 = vmatmul.f32.gmra.mxu0 %v1263_v42  ;;  %v603_v13 = vld [vmem:[#allocation8 + $0x200] sm:$0xff] }
  0x63   :  { %493 = vmatpush.msra.mxu2 %v109_v15  ;;  %515 = vmatpush.msra.mxu0 %v211_v16  ;;  %v693_v15 = vld [vmem:[#allocation8 + $0x4d0] sm:$0xff]  ;;  %v570_v16 = vld [vmem:[#allocation8 + $0xf8] sm:$0xff] }
  0x64   :  { %737 = vmatpush.msrb.mxu1 %v569_v17  ;;  %762 = vmatpush.msrb.mxu3 %v597_v18  ;;  %v581_v17 = vld [vmem:[#allocation8 + $0x150] sm:$0xff]  ;;  %v639_v18 = vld [vmem:[#allocation8 + $0x320] sm:$0xff] }
  0x65   :  { %494 = vmatpush.msra.mxu2 %v103_v19  ;;  %516 = vmatpush.msra.mxu0 %v205_v20  ;;  %v691_v19 = vld [vmem:[#allocation8 + $0x4c0] sm:$0xff]  ;;  %v568_v20 = vld [vmem:[#allocation8 + $0xe8] sm:$0xff] }
  0x66   :  { %738 = vmatpush.msrb.mxu1 %v567_v21  ;;  %763 = vmatpush.msrb.mxu3 %v595_v22  ;;  %v579_v21 = vld [vmem:[#allocation8 + $0x140] sm:$0xff]  ;;  %v637_v22 = vld [vmem:[#allocation8 + $0x310] sm:$0xff] }
  0x67   :  { %495 = vmatpush.msra.mxu2 %v97_v23  ;;  %517 = vmatpush.msra.mxu0 %v199_v24  ;;  %v689_v23 = vld [vmem:[#allocation8 + $0x4b0] sm:$0xff]  ;;  %v566_v24 = vld [vmem:[#allocation8 + $0xd8] sm:$0xff] }
  0x68   :  { %739 = vmatpush.msrb.mxu1 %v565_v25  ;;  %764 = vmatpush.msrb.mxu3 %v593_v27  ;;  %v577_v25 = vld [vmem:[#allocation8 + $0x130] sm:$0xff]  ;;  %v635_v27 = vld [vmem:[#allocation8 + $0x300] sm:$0xff] }
  0x69   :  { %496 = vmatpush.msra.mxu2 %v91_v28  ;;  %518 = vmatpush.msra.mxu0 %v193_v29  ;;  %v687_v28 = vld [vmem:[#allocation8 + $0x4a0] sm:$0xff]  ;;  %v564_v29 = vld [vmem:[#allocation8 + $0xc8] sm:$0xff] }
  0x6a   :  { %1047 = vmatmul.msk.f32.gmra.mxu1 %vm244_vm0, %v1250_v9  ;;  %497 = vmatmul.f32.vlgmr.msra.gmra.mxu2 %v1256_v26  ;;  %v587_v26 = vld [vmem:[#allocation8 + $0x180] sm:$0xff] }
  0x6b   :  { %519 = vmatpush.msra.mxu0 %v187_v30  ;;  %740 = vmatpush.msrb.mxu1 %v563_v31  ;;  %v575_v30 = vld [vmem:[#allocation8 + $0x120] sm:$0xff]  ;;  %v602_v31 = vld [vmem:[#allocation8 + $0x1f8] sm:$0xff] }
  0x6c   :  { %1048 = vmatmul.msk.f32.vlgmr.msra.gmra.mxu0 %vm244_vm0, %v1244_v56  ;;  %806 = vmatpush.msrb.mxu2 %v665_v32  ;;  %v659_v56 = vld [vmem:[#allocation8 + $0x3c0] sm:$0xff]  ;;  %v685_v32 = vld [vmem:[#allocation8 + $0x490] sm:$0xff] }
  0x6d   :  { %783 = vmatpush.msrb.mxu0 %v633_v33  ;;  %741 = vmatpush.msrb.mxu1 %v561_v34  ;;  %v562_v33 = vld [vmem:[#allocation8 + $0xb8] sm:$0xff]  ;;  %v573_v34 = vld [vmem:[#allocation8 + $0x110] sm:$0xff] }
  0x6e   :  { %807 = vmatpush.msrb.mxu2 %v663_v35  ;;  %765 = vmatpush.msrb.mxu3 %v591_v36  ;;  %v600_v35 = vld [vmem:[#allocation8 + $0x1e8] sm:$0xff]  ;;  %v683_v36 = vld [vmem:[#allocation8 + $0x480] sm:$0xff] }
  0x6f   :  { %784 = vmatpush.msrb.mxu0 %v631_v37  ;;  %742 = vmatpush.msrb.mxu1 %v559_v38  ;;  %v560_v37 = vld [vmem:[#allocation8 + $0xa8] sm:$0xff]  ;;  %v571_v38 = vld [vmem:[#allocation8 + $0x100] sm:$0xff] }
  0x70   :  { %808 = vmatpush.msrb.mxu2 %v661_v39  ;;  %766 = vmatpush.msrb.mxu3 %v589_v40  ;;  %v598_v39 = vld [vmem:[#allocation8 + $0x1d8] sm:$0xff]  ;;  %v681_v40 = vld [vmem:[#allocation8 + $0x470] sm:$0xff] }
  0x71   :  { %785 = vmatpush.msrb.mxu0 %v629_v41  ;;  %743 = vmatpush.msrb.mxu1 %v557_v43  ;;  %v729_v41 = vld [vmem:[#allocation8 + $0x5f0] sm:$0xff]  ;;  %v558_v43 = vld [vmem:[#allocation8 + $0x98] sm:$0xff] }
  0x72   :  { %500 = vmatmul.f32.gmra.mxu2 %v1263_v42  ;;  %767 = vmatpush.msrb.mxu3 %v587_v26  ;;  %v653_v42 = vld [vmem:[#allocation8 + $0x390] sm:$0xff]  ;;  %v596_v26 = vld [vmem:[#allocation8 + $0x1c8] sm:$0xff] }
  0x73   :  { %786 = vmatpush.msrb.mxu0 %v627_v44  ;;  %744 = vmatpush.msrb.mxu1 %v555_v45  ;;  %v679_v44 = vld [vmem:[#allocation8 + $0x460] sm:$0xff] }
  0x74   :  { %1049 = vmatmul.msk.f32.gmra.mxu0 %vm244_vm0, %v1250_v9  ;;  %809 = vmatpush.msrb.mxu2 %v659_v56  ;;  %v617_v9 = vld [vmem:[#allocation8 + $0x270] sm:$0xff]  ;;  %v727_v45 = vld [vmem:[#allocation8 + $0x5e0] sm:$0xff]  ;;  %v556_v56 = vld [vmem:[#allocation8 + $0x88] sm:$0xff] }
  0x75   :  { %787 = vmatpush.msrb.mxu0 %v625_v46  ;;  %745 = vmatpush.msrb.mxu1 %v553_v47  ;;  %v594_v46 = vld [vmem:[#allocation8 + $0x1b8] sm:$0xff]  ;;  %v677_v47 = vld [vmem:[#allocation8 + $0x450] sm:$0xff] }
  0x76   :  { %810 = vmatpush.msrb.mxu2 %v657_v48  ;;  %768 = vmatpush.msrb.mxu3 %v585_v49  ;;  %v725_v48 = vld [vmem:[#allocation8 + $0x5d0] sm:$0xff]  ;;  %v554_v49 = vld [vmem:[#allocation8 + $0x78] sm:$0xff] }
  0x77   :  { %788 = vmatpush.msrb.mxu0 %v623_v50  ;;  %746 = vmatpush.msrb.mxu1 %v551_v51  ;;  %v592_v50 = vld [vmem:[#allocation8 + $0x1a8] sm:$0xff]  ;;  %v675_v51 = vld [vmem:[#allocation8 + $0x440] sm:$0xff] }
  0x78   :  { %811 = vmatpush.msrb.mxu2 %v655_v52  ;;  %769 = vmatpush.msrb.mxu3 %v583_v12  ;;  %v723_v52 = vld [vmem:[#allocation8 + $0x5c0] sm:$0xff] }
  0x79   :  { %789 = vmatpush.msrb.mxu0 %v621_v53  ;;  %747 = vmatpush.msrb.mxu1 %v549_v54  ;;  %v552_v53 = vld [vmem:[#allocation8 + $0x68] sm:$0xff]  ;;  %v590_v54 = vld [vmem:[#allocation8 + $0x198] sm:$0xff]  ;;  %v711_v12 = vld [vmem:[#allocation8 + $0x560] sm:$0xff] }
  0x7a   :  { %812 = vmatpush.msrb.mxu2 %v653_v42  ;;  %770 = vmatpush.msrb.mxu3 %v581_v17  ;;  %v673_v42 = vld [vmem:[#allocation8 + $0x430] sm:$0xff] }
  0x7b   :  { %790 = vmatpush.msrb.mxu0 %v619_v55  ;;  %748 = vmatpush.msrb.mxu1 %v547_v57  ;;  %v721_v55 = vld [vmem:[#allocation8 + $0x5b0] sm:$0xff]  ;;  %v550_v57 = vld [vmem:[#allocation8 + $0x58] sm:$0xff] }
  0x7c   :  { %813 = vmatpush.msrb.mxu2 %v651_v58  ;;  %771 = vmatpush.msrb.mxu3 %v579_v21  ;;  %v588_v58 = vld [vmem:[#allocation8 + $0x188] sm:$0xff]  ;;  %v705_v21 = vld [vmem:[#allocation8 + $0x530] sm:$0xff] }
  0x7d   :  { %791 = vmatpush.msrb.mxu0 %v617_v9  ;;  %749 = vmatpush.msrb.mxu1 %v545_v59  ;;  %v671_v9 = vld [vmem:[#allocation8 + $0x420] sm:$0xff] }
  0x7e   :  { %814 = vmatpush.msrb.mxu2 %v649_v60  ;;  %772 = vmatpush.msrb.mxu3 %v577_v25  ;;  %v719_v59 = vld [vmem:[#allocation8 + $0x5a0] sm:$0xff]  ;;  %v548_v60 = vld [vmem:[#allocation8 + $0x48] sm:$0xff]  ;;  %v701_v25 = vld [vmem:[#allocation8 + $0x510] sm:$0xff] }
  0x7f   :  { %792 = vmatpush.msrb.mxu0 %v615_v61  ;;  %750 = vmatpush.msrb.mxu1 %v543_v62  ;;  %v586_v61 = vld [vmem:[#allocation8 + $0x178] sm:$0xff]  ;;  %v669_v62 = vld [vmem:[#allocation8 + $0x410] sm:$0xff] }
  0x80   :  { %815 = vmatpush.msrb.mxu2 %v647_v63  ;;  %773 = vmatpush.msrb.mxu3 %v575_v30  ;;  %v717_v63 = vld [vmem:[#allocation8 + $0x590] sm:$0xff]  ;;  %v699_v30 = vld [vmem:[#allocation8 + $0x500] sm:$0xff] }
  0x81   :  { %793 = vmatpush.msrb.mxu0 %v613_v0  ;;  %751 = vmatpush.msrb.mxu1 %v541_v1  ;;  %v546_v0 = vld [vmem:[#allocation8 + $0x38] sm:$0xff] }
  0x82   :  { %816 = vmatpush.msrb.mxu2 %v645_v2  ;;  %774 = vmatpush.msrb.mxu3 %v573_v34  ;;  %v584_v2 = vld [vmem:[#allocation8 + $0x168] sm:$0xff] }
  0x83   :  { %794 = vmatpush.msrb.mxu0 %v611_v3  ;;  %752 = vmatpush.msrb.mxu1 %v539_v4  ;;  %v667_v3 = vld [vmem:[#allocation8 + $0x400] sm:$0xff] }
  0x84   :  { %817 = vmatpush.msrb.mxu2 %v643_v10  ;;  %775 = vmatpush.msrb.mxu3 %v571_v38  ;;  %v715_v4 = vld [vmem:[#allocation8 + $0x580] sm:$0xff]  ;;  %v542_v10 = vld [vmem:[#allocation8 + $0x18] sm:$0xff] }
  0x85   :  { %829 = vmatpush.msra.mxu1 %v697_v5  ;;  %795 = vmatpush.msrb.mxu0 %v609_v6  ;;  %v544_v5 = vld [vmem:[#allocation8 + $0x28] sm:$0xff] }
  0x86   :  { %818 = vmatpush.msrb.mxu2 %v641_v14  ;;  %852 = vmatpush.msra.mxu3 %v729_v41  ;;  %v578_v14 = vld [vmem:[#allocation8 + $0x138] sm:$0xff] }
  0x87   :  { %796 = vmatpush.msrb.mxu0 %v607_v7  ;;  %830 = vmatpush.msra.mxu1 %v695_v11  ;;  %v582_v7 = vld [vmem:[#allocation8 + $0x158] sm:$0xff]  ;;  %v580_v11 = vld [vmem:[#allocation8 + $0x148] sm:$0xff] }
  0x88   :  { %819 = vmatpush.msrb.mxu2 %v639_v18  ;;  %853 = vmatpush.msra.mxu3 %v727_v45  ;;  %v707_v18 = vld [vmem:[#allocation8 + $0x540] sm:$0xff]  ;;  %v698_v45 = vld [vmem:[#allocation8 + $0x4f8] sm:$0xff] }
  0x89   :  { %797 = vmatpush.msrb.mxu0 %v605_v8  ;;  %831 = vmatpush.msra.mxu1 %v693_v15  ;;  %v713_v8 = vld [vmem:[#allocation8 + $0x570] sm:$0xff] }
  0x8a   :  { %820 = vmatpush.msrb.mxu2 %v637_v22  ;;  %854 = vmatpush.msra.mxu3 %v725_v48  ;;  %v709_v15 = vld [vmem:[#allocation8 + $0x550] sm:$0xff]  ;;  %v572_v22 = vld [vmem:[#allocation8 + $0x108] sm:$0xff] }
  0x8b   :  { %798 = vmatpush.msrb.mxu0 %v603_v13  ;;  %832 = vmatpush.msra.mxu1 %v691_v19  ;;  %v540_v13 = vld [vmem:[#allocation8 + $0x8] sm:$0xff]  ;;  %v574_v19 = vld [vmem:[#allocation8 + $0x118] sm:$0xff] }
  0x8c   :  { %821 = vmatpush.msrb.mxu2 %v635_v27  ;;  %855 = vmatpush.msra.mxu3 %v723_v52  ;;  %v664_v48 = vld [vmem:[#allocation8 + $0x3e8] sm:$0xff] }
  0x8d   :  { %875 = vmatpush.msra.mxu0 %v570_v16  ;;  %833 = vmatpush.msra.mxu1 %v689_v23  ;;  %v576_v16 = vld [vmem:[#allocation8 + $0x128] sm:$0xff]  ;;  %v1288_v23 = vld [vmem:[#allocation7] sm:$0x3f] }
  0x8e   :  { %898 = vmatpush.msra.mxu2 %v602_v31  ;;  %856 = vmatpush.msra.mxu3 %v721_v55  ;;  %v232_v27 = vperm.slane %v1288_v23, 0  ;;  %v662_v55 = vld [vmem:[#allocation8 + $0x3d8] sm:$0xff] }
  0x8f   :  { %876 = vmatpush.msra.mxu0 %v568_v20  ;;  %834 = vmatpush.msra.mxu1 %v687_v28  ;;  %v234_v28 = vperm.slane %v1288_v23, 2 }
  0x90   :  { %899 = vmatpush.msra.mxu2 %v600_v35  ;;  %857 = vmatpush.msra.mxu3 %v719_v59 }
  0x91   :  { %877 = vmatpush.msra.mxu0 %v566_v24  ;;  %835 = vmatpush.msra.mxu1 %v685_v32  ;;  %v703_v24 = vld [vmem:[#allocation8 + $0x520] sm:$0xff] }
  0x92   :  { %900 = vmatpush.msra.mxu2 %v598_v39  ;;  %858 = vmatpush.msra.mxu3 %v717_v63 }
  0x93   :  { %878 = vmatpush.msra.mxu0 %v564_v29  ;;  %836 = vmatpush.msra.mxu1 %v683_v36  ;;  %v233_v29 = vperm.slane %v1288_v23, 1 }
  0x94   :  { %901 = vmatpush.msra.mxu2 %v596_v26  ;;  %859 = vmatpush.msra.mxu3 %v715_v4  ;;  %v634_v26 = vld [vmem:[#allocation8 + $0x2f8] sm:$0xff] }
  0x95   :  { %879 = vmatpush.msra.mxu0 %v562_v33  ;;  %837 = vmatpush.msra.mxu1 %v681_v40 }
  0x96   :  { %902 = vmatpush.msra.mxu2 %v594_v46  ;;  %860 = vmatpush.msra.mxu3 %v713_v8  ;;  %v632_v46 = vld [vmem:[#allocation8 + $0x2e8] sm:$0xff] }
  0x97   :  { %880 = vmatpush.msra.mxu0 %v560_v37  ;;  %838 = vmatpush.msra.mxu1 %v679_v44  ;;  %v688_v8 = vld [vmem:[#allocation8 + $0x4a8] sm:$0xff] }
  0x98   :  { %903 = vmatpush.msra.mxu2 %v592_v50  ;;  %861 = vmatpush.msra.mxu3 %v711_v12  ;;  %v622_v12 = vld [vmem:[#allocation8 + $0x298] sm:$0xff] }
  0x99   :  { %881 = vmatpush.msra.mxu0 %v558_v43  ;;  %839 = vmatpush.msra.mxu1 %v677_v47  ;;  %v696_v47 = vld [vmem:[#allocation8 + $0x4e8] sm:$0xff] }
  0x9a   :  { %904 = vmatpush.msra.mxu2 %v590_v54  ;;  %862 = vmatpush.msra.mxu3 %v709_v15  ;;  %v686_v15 = vld [vmem:[#allocation8 + $0x498] sm:$0xff] }
  0x9b   :  { %882 = vmatpush.msra.mxu0 %v556_v56  ;;  %840 = vmatpush.msra.mxu1 %v675_v51  ;;  %v666_v56 = vld [vmem:[#allocation8 + $0x3f8] sm:$0xff] }
  0x9c   :  { %905 = vmatpush.msra.mxu2 %v588_v58  ;;  %863 = vmatpush.msra.mxu3 %v707_v18  ;;  %v630_v51 = vld [vmem:[#allocation8 + $0x2d8] sm:$0xff]  ;;  %v620_v18 = vld [vmem:[#allocation8 + $0x288] sm:$0xff] }
  0x9d   :  { %883 = vmatpush.msra.mxu0 %v554_v49  ;;  %841 = vmatpush.msra.mxu1 %v673_v42  ;;  %v694_v42 = vld [vmem:[#allocation8 + $0x4d8] sm:$0xff] }
  0x9e   :  { %906 = vmatpush.msra.mxu2 %v586_v61  ;;  %864 = vmatpush.msra.mxu3 %v705_v21  ;;  %v692_v61 = vld [vmem:[#allocation8 + $0x4c8] sm:$0xff]  ;;  %v618_v21 = vld [vmem:[#allocation8 + $0x278] sm:$0xff] }
  0x9f   :  { %884 = vmatpush.msra.mxu0 %v552_v53  ;;  %842 = vmatpush.msra.mxu1 %v671_v9  ;;  %v628_v9 = vld [vmem:[#allocation8 + $0x2c8] sm:$0xff] }
  0xa0   :  { %907 = vmatpush.msra.mxu2 %v584_v2  ;;  %865 = vmatpush.msra.mxu3 %v703_v24  ;;  %v626_v2 = vld [vmem:[#allocation8 + $0x2b8] sm:$0xff] }
  0xa1   :  { %885 = vmatpush.msra.mxu0 %v550_v57  ;;  %843 = vmatpush.msra.mxu1 %v669_v62  ;;  %v660_v62 = vld [vmem:[#allocation8 + $0x3c8] sm:$0xff] }
  0xa2   :  { %908 = vmatpush.msra.mxu2 %v582_v7  ;;  %866 = vmatpush.msra.mxu3 %v701_v25  ;;  %v624_v7 = vld [vmem:[#allocation8 + $0x2a8] sm:$0xff]  ;;  %v730_v25 = vld [vmem:[#allocation8 + $0x5f8] sm:$0xff] }
  0xa3   :  { %886 = vmatpush.msra.mxu0 %v548_v60  ;;  %844 = vmatpush.msra.mxu1 %v667_v3  ;;  %v235_v3 = vperm.slane %v1288_v23, 3 }
  0xa4   :  { %909 = vmatpush.msra.mxu2 %v580_v11  ;;  %867 = vmatpush.msra.mxu3 %v699_v30  ;;  %v650_v30 = vld [vmem:[#allocation8 + $0x378] sm:$0xff] }
  0xa5   :  { %887 = vmatpush.msra.mxu0 %v546_v0 }
  0xa6   :  { %910 = vmatpush.msra.mxu2 %v578_v14 }
  0xa7   :  { %888 = vmatpush.msra.mxu0 %v544_v5  ;;  %v690_v5 = vld [vmem:[#allocation8 + $0x4b8] sm:$0xff] }
  0xa8   :  { %911 = vmatpush.msra.mxu2 %v576_v16  ;;  %v654_v16 = vld [vmem:[#allocation8 + $0x398] sm:$0xff] }
  0xa9   :  { %889 = vmatpush.msra.mxu0 %v542_v10  ;;  %v656_v10 = vld [vmem:[#allocation8 + $0x3a8] sm:$0xff] }
  0xaa   :  { %912 = vmatpush.msra.mxu2 %v574_v19 }
  0xab   :  { %890 = vmatpush.msra.mxu0 %v540_v13 }
  0xac   :  { %913 = vmatpush.msra.mxu2 %v572_v22 }
  0xb2   :  { %v291_v1 = vpop.f32.mrf.mxu1 }
  0xb4   :  { %v337_v6 = vpop.f32.mrf.mxu3 }
  0xbb   :  { %v294_v17 = vpop.f32.mrf.mxu1 }
  0xbd   :  { %v340_v20 = vpop.f32.mrf.mxu3 }
  0xc5   :  { %v268_v31 = vpop.f32.mrf.mxu0  ;;  %v360_v32 = vpop.f32.mrf.mxu1 }
  0xc6   :  { %v269_v33 = vadd.f32 %v268_v31, %v232_v27  ;;  %v361_v34 = vadd.f32 %v360_v32, %v234_v28  ;;  %v314_v35 = vpop.f32.mrf.mxu2  ;;  %v383_v36 = vpop.f32.mrf.mxu3  ;;  %v728_v31 = vld [vmem:[#allocation8 + $0x5e8] sm:$0xff]  ;;  %v682_v32 = vld [vmem:[#allocation8 + $0x478] sm:$0xff] }
  0xc7   :  { %v315_v37 = vadd.f32 %v314_v35, %v233_v29  ;;  %v614_v35 = vld [vmem:[#allocation8 + $0x258] sm:$0xff] }
  0xc8   :  { %v1293_v38 = vadd.f32 %v291_v1, %v269_v33  ;;  %v1295_v39 = vadd.f32 %v383_v36, %v361_v34  ;;  %v648_v36 = vld [vmem:[#allocation8 + $0x368] sm:$0xff] }
  0xc9   :  { %v1297_v40 = vadd.f32 %v337_v6, %v315_v37  ;;  %v658_v6 = vld [vmem:[#allocation8 + $0x3b8] sm:$0xff] }
  0xca   :  { %v527_v41 = vmax.f32 %v1293_v38, 0.0  ;;  %v529_v43 = vmax.f32 %v1295_v39, 0.0  ;;  %v726_v38 = vld [vmem:[#allocation8 + $0x5d8] sm:$0xff] }
  0xcb   :  { %v528_v44 = vmax.f32 %v1297_v40, 0.0  ;;  %v706_v40 = vld [vmem:[#allocation8 + $0x538] sm:$0xff] }
  0xcc   :  { %799 = vmatmul.f32.vlgmr.msrb.gmra.mxu0 %v529_v43  ;;  %753 = vmatmul.f32.vlgmr.msrb.gmra.mxu1 %v527_v41 }
  0xcd   :  { %776 = vmatmul.f32.vlgmr.msrb.gmra.mxu3 %v528_v44  ;;  %921 = vmatpush.msrb.mxu1 %v634_v26 }
  0xce   :  { %v271_v49 = vpop.f32.mrf.mxu0  ;;  %v363_v50 = vpop.f32.mrf.mxu1  ;;  %967 = vmatpush.msrb.mxu0 %v698_v45  ;;  %944 = vmatpush.msrb.mxu3 %v666_v56  ;;  %v646_v56 = vld [vmem:[#allocation8 + $0x358] sm:$0xff] }
  0xcf   :  { %v272_v52 = vadd.f32 %v271_v49, %v232_v27  ;;  %v364_v53 = vadd.f32 %v363_v50, %v234_v28  ;;  %v317_v54 = vpop.f32.mrf.mxu2  ;;  %922 = vmatpush.msrb.mxu1 %v632_v46  ;;  %v684_v27 = vld [vmem:[#allocation8 + $0x488] sm:$0xff] }
  0xd0   :  { %v318_v57 = vadd.f32 %v317_v54, %v233_v29  ;;  %v386_v58 = vpop.f32.mrf.mxu3  ;;  %968 = vmatpush.msrb.mxu0 %v696_v47  ;;  %945 = vmatpush.msrb.mxu3 %v664_v48  ;;  %v616_v29 = vld [vmem:[#allocation8 + $0x268] sm:$0xff] }
  0xd1   :  { %v1308_v59 = vadd.f32 %v386_v58, %v364_v53  ;;  %923 = vmatpush.msrb.mxu1 %v630_v51  ;;  %v1310_v60 = vadd.f32 %v294_v17, %v272_v52  ;;  %v236_v17 = vperm.slane %v1288_v23, 4  ;;  %v724_v48 = vld [vmem:[#allocation8 + $0x5c8] sm:$0xff]  ;;  %v722_v52 = vld [vmem:[#allocation8 + $0x5b8] sm:$0xff] }
  0xd2   :  { %v1312_v63 = vadd.f32 %v340_v20, %v318_v57  ;;  %969 = vmatpush.msrb.mxu0 %v694_v42  ;;  %946 = vmatpush.msrb.mxu3 %v662_v55  ;;  %v652_v20 = vld [vmem:[#allocation8 + $0x388] sm:$0xff]  ;;  %v678_v53 = vld [vmem:[#allocation8 + $0x458] sm:$0xff] }
  0xd3   :  { %v535_v0 = vmax.f32 %v1308_v59, 0.0  ;;  %924 = vmatpush.msrb.mxu1 %v628_v9  ;;  %v533_v1 = vmax.f32 %v1310_v60, 0.0  ;;  %v612_v49 = vld [vmem:[#allocation8 + $0x248] sm:$0xff]  ;;  %v610_v42 = vld [vmem:[#allocation8 + $0x238] sm:$0xff] }
  0xd4   :  { %v534_v4 = vmax.f32 %v1312_v63, 0.0  ;;  %970 = vmatpush.msrb.mxu0 %v692_v61  ;;  %947 = vmatpush.msrb.mxu3 %v660_v62  ;;  %v644_v55 = vld [vmem:[#allocation8 + $0x348] sm:$0xff]  ;;  %v642_v62 = vld [vmem:[#allocation8 + $0x338] sm:$0xff] }
  0xd5   :  { %802 = vmatmul.f32.gmra.mxu0 %v535_v0  ;;  %756 = vmatmul.f32.gmra.mxu1 %v533_v1  ;;  %v720_v57 = vld [vmem:[#allocation8 + $0x5a8] sm:$0xff]  ;;  %v731_v63 = vld [vmem:[%s1372_s4] sm:$0x3]  ;;  %s1195_s4 = smov [#allocation10]  }
  0xd6   :  { %779 = vmatmul.f32.gmra.mxu3 %v534_v4  ;;  %925 = vmatpush.msrb.mxu1 %v626_v2  ;;  %v676_v58 = vld [vmem:[#allocation8 + $0x448] sm:$0xff]  ;;  %s1021_s15 = sshll.u32 %s1195_s4, 4  ;;  %s1022_s15 = int_to_ptr.vmem [resolvable:$true] %s1021_s15 }
  0xd7   :  { %v406_v11 = vpop.f32.mrf.mxu0  ;;  %971 = vmatpush.msrb.mxu0 %v690_v5  ;;  %948 = vmatpush.msrb.mxu3 %v658_v6  ;;  %v608_v61 = vld [vmem:[#allocation8 + $0x228] sm:$0xff]  ;;  %v674_v5 = vld [vmem:[#allocation8 + $0x438] sm:$0xff]  ;;  %v237_v6 = vperm.slane %v1288_v23, 5 }
  0xd8   :  { %v407_v13 = vadd.f32 %v406_v11, %v235_v3  ;;  %v429_v14 = vpop.f32.mrf.mxu2  ;;  %926 = vmatpush.msrb.mxu1 %v624_v7  ;;  %v640_v60 = vld [vmem:[#allocation8 + $0x328] sm:$0xff] }
  0xd9   :  { %972 = vmatpush.msrb.mxu0 %v688_v8  ;;  %949 = vmatpush.msrb.mxu3 %v656_v10  ;;  %v716_v7 = vld [vmem:[#allocation8 + $0x588] sm:$0xff]  ;;  %v606_v8 = vld [vmem:[#allocation8 + $0x218] sm:$0xff] }
  0xda   :  { %v1325_v19 = vadd.f32 %v429_v14, %v407_v13  ;;  %927 = vmatpush.msrb.mxu1 %v622_v12  ;;  %v672_v11 = vld [vmem:[#allocation8 + $0x428] sm:$0xff]  ;;  %v714_v12 = vld [vmem:[#allocation8 + $0x578] sm:$0xff] }
  0xdb   :  { %973 = vmatpush.msrb.mxu0 %v686_v15  ;;  %950 = vmatpush.msrb.mxu3 %v654_v16  ;;  %v604_v13 = vld [vmem:[#allocation8 + $0x208] sm:$0xff]  ;;  %v670_v15 = vld [vmem:[#allocation8 + $0x418] sm:$0xff] }
  0xdc   :  { %v530_v22 = vmax.f32 %v1325_v19, 0.0  ;;  %v452_v24 = vpop.f32.mrf.mxu3  ;;  %928 = vmatpush.msrb.mxu1 %v620_v18  ;;  %v638_v16 = vld [vmem:[#allocation8 + $0x318] sm:$0xff]  ;;  %v712_v23 = vld [vmem:[#allocation8 + $0x568] sm:$0xff] }
  0xdd   :  { %v453_v28 = vadd.f32 %v452_v24, %v236_v17  ;;  %891 = vmatmul.f32.vlgmr.msra.gmra.mxu0 %v527_v41  ;;  %951 = vmatpush.msrb.mxu3 %v652_v20  ;;  %v680_v41 = vld [vmem:[#allocation8 + $0x468] sm:$0xff]  ;;  %v710_v24 = vld [vmem:[#allocation8 + $0x558] sm:$0xff] }
  0xde   :  { %822 = vmatmul.f32.vlgmr.msrb.gmra.mxu2 %v530_v22  ;;  %929 = vmatpush.msrb.mxu1 %v618_v21  ;;  %v668_v18 = vld [vmem:[#allocation8 + $0x408] sm:$0xff] }
  0xdf   :  { %v475_v33 = vpop.f32.mrf.mxu1  ;;  %v409_v34 = vpop.f32.mrf.mxu0  ;;  %990 = vmatpush.msrb.mxu2 %v730_v25  ;;  %974 = vmatpush.msrb.mxu0 %v684_v27  ;;  %v636_v20 = vld [vmem:[#allocation8 + $0x308] sm:$0xff] }
  0xe0   :  { %v1332_v37 = vadd.f32 %v475_v33, %v453_v28  ;;  %v410_v26 = vadd.f32 %v409_v34, %v235_v3  ;;  %930 = vmatpush.msrb.mxu1 %v616_v29  ;;  %952 = vmatpush.msrb.mxu3 %v650_v30  ;;  %v718_v3 = vld [vmem:[#allocation8 + $0x598] sm:$0xff]  ;;  %v708_v27 = vld [vmem:[#allocation8 + $0x548] sm:$0xff] }
  0xe1   :  { %v432_v45 = vpop.f32.mrf.mxu2  ;;  %991 = vmatpush.msrb.mxu2 %v728_v31  ;;  %975 = vmatpush.msrb.mxu0 %v682_v32  ;;  %v704_v30 = vld [vmem:[#allocation8 + $0x528] sm:$0xff]  ;;  %v702_v32 = vld [vmem:[#allocation8 + $0x518] sm:$0xff] }
  0xe2   :  { %v531_v46 = vmax.f32 %v1332_v37, 0.0  ;;  %v1335_v47 = vadd.f32 %v432_v45, %v410_v26  ;;  %931 = vmatpush.msrb.mxu1 %v614_v35  ;;  %953 = vmatpush.msrb.mxu3 %v648_v36  ;;  %v700_v34 = vld [vmem:[#allocation8 + $0x508] sm:$0xff]  ;;  %v733_v35 = vperm.slane %v731_v63, 0 }
  0xe3   :  { %992 = vmatpush.msrb.mxu2 %v726_v38  ;;  %976 = vmatpush.msrb.mxu0 %v680_v41 }
  0xe4   :  { %v536_v50 = vmax.f32 %v1335_v47, 0.0  ;;  %845 = vmatmul.f32.vlgmr.msra.gmra.mxu1 %v531_v46  ;;  %v455_v51 = vpop.f32.mrf.mxu3  ;;  %954 = vmatpush.msrb.mxu3 %v646_v56 }
  0xe5   :  { %v456_v54 = vadd.f32 %v455_v51, %v236_v17  ;;  %993 = vmatpush.msrb.mxu2 %v724_v48  ;;  %894 = vmatmul.f32.gmra.mxu0 %v533_v1 }
  0xe6   :  { %825 = vmatmul.f32.gmra.mxu2 %v536_v50  ;;  %932 = vmatpush.msrb.mxu1 %v612_v49 }
  0xe7   :  { %v478_v9 = vpop.f32.mrf.mxu1  ;;  %994 = vmatpush.msrb.mxu2 %v722_v52  ;;  %977 = vmatpush.msrb.mxu0 %v678_v53 }
  0xe8   :  { %v479_v2 = vadd.f32 %v478_v9, %v456_v54  ;;  %933 = vmatpush.msrb.mxu1 %v610_v42  ;;  %955 = vmatpush.msrb.mxu3 %v644_v55  ;;  %v734_v42 = vperm.slane %v731_v63, 1 }
  0xe9   :  { %995 = vmatpush.msrb.mxu2 %v720_v57  ;;  %978 = vmatpush.msrb.mxu0 %v676_v58  ;;  %v521_v10 = vpop.f32.mrf.mxu0 }
  0xea   :  { %v537_v1 = vmax.f32 %v479_v2, 0.0  ;;  %934 = vmatpush.msrb.mxu1 %v608_v61  ;;  %956 = vmatpush.msrb.mxu3 %v642_v62 }
  0xeb   :  { %996 = vmatpush.msrb.mxu2 %v718_v3  ;;  %979 = vmatpush.msrb.mxu0 %v674_v5 }
  0xec   :  { %848 = vmatmul.f32.gmra.mxu1 %v537_v1  ;;  %957 = vmatpush.msrb.mxu3 %v640_v60 }
  0xed   :  { %v498_v14 = vpop.f32.mrf.mxu2  ;;  %997 = vmatpush.msrb.mxu2 %v716_v7  ;;  %935 = vmatpush.msrb.mxu1 %v606_v8 }
  0xee   :  { %v499_v17 = vadd.f32 %v498_v14, %v237_v6  ;;  %914 = vmatmul.f32.vlgmr.msra.gmra.mxu2 %v528_v44  ;;  %980 = vmatpush.msrb.mxu0 %v672_v11 }
  0xef   :  { %998 = vmatpush.msrb.mxu2 %v714_v12  ;;  %936 = vmatpush.msrb.mxu1 %v604_v13 }
  0xf0   :  { %v522_v21 = vadd.f32 %v521_v10, %v499_v17  ;;  %981 = vmatpush.msrb.mxu0 %v670_v15  ;;  %958 = vmatpush.msrb.mxu3 %v638_v16 }
  0xf1   :  { %999 = vmatpush.msrb.mxu2 %v712_v23  ;;  %v524_v28 = vpop.f32.mrf.mxu0 }
  0xf2   :  { %v532_v25 = vmax.f32 %v522_v21, 0.0  ;;  %982 = vmatpush.msrb.mxu0 %v668_v18  ;;  %959 = vmatpush.msrb.mxu3 %v636_v20 }
  0xf3   :  { %1000 = vmatpush.msrb.mxu2 %v710_v24  ;;  %983 = vmatmul.f32.vlgmr.msrb.gmra.mxu0 %v531_v46 }
  0xf4   :  { %868 = vmatmul.f32.vlgmr.msra.gmra.mxu3 %v532_v25  ;;  %937 = vmatmul.f32.vlgmr.msrb.gmra.mxu1 %v529_v43 }
  0xf5   :  { %v501_v44 = vpop.f32.mrf.mxu2  ;;  %1001 = vmatpush.msrb.mxu2 %v708_v27 }
  0xf6   :  { %v502_v29 = vadd.f32 %v501_v44, %v237_v6  ;;  %917 = vmatmul.f32.gmra.mxu2 %v534_v4 }
  0xf7   :  { %1002 = vmatpush.msrb.mxu2 %v706_v40 }
  0xf8   :  { %v525_v31 = vadd.f32 %v524_v28, %v502_v29 }
  0xf9   :  { %1003 = vmatpush.msrb.mxu2 %v704_v30 }
  0xfa   :  { %v538_v33 = vmax.f32 %v525_v31, 0.0 }
  0xfb   :  { %1004 = vmatpush.msrb.mxu2 %v702_v32  ;;  %986 = vmatmul.f32.gmra.mxu0 %v537_v1 }
  0xfc   :  { %871 = vmatmul.f32.gmra.mxu3 %v538_v33  ;;  %940 = vmatmul.f32.gmra.mxu1 %v535_v0 }
  0xfd   :  { %1005 = vmatpush.msrb.mxu2 %v700_v34 }
  0xfe   :  { %1006 = vmatmul.f32.vlgmr.msrb.gmra.mxu2 %v532_v25 }
 0x104   :  { %960 = vmatmul.f32.vlgmr.msrb.gmra.mxu3 %v530_v22 }
 0x106   :  { %1009 = vmatmul.f32.gmra.mxu2 %v538_v33 }
 0x10c   :  { %963 = vmatmul.f32.gmra.mxu3 %v536_v50 }
 0x149   :  { %v754_v39 = vpop.f32.mrf.mxu1  ;;  %v800_v43 = vpop.f32.mrf.mxu0 }
 0x14a   :  { %v755_v0 = vadd.f32 %v754_v39, %v733_v35 }
 0x150   :  { %v777_v36 = vpop.f32.mrf.mxu3 }
 0x151   :  { %v778_v38 = vadd.f32 %v777_v36, %v755_v0 }
 0x152   :  { %v757_v59 = vpop.f32.mrf.mxu1  ;;  %v803_v37 = vpop.f32.mrf.mxu0 }
 0x153   :  { %v758_v41 = vadd.f32 %v757_v59, %v733_v35  ;;  %v801_v45 = vadd.f32 %v800_v43, %v778_v38 }
 0x159   :  { %v780_v19 = vpop.f32.mrf.mxu3 }
 0x15a   :  { %v892_v46 = vpop.f32.mrf.mxu0  ;;  %v781_v47 = vadd.f32 %v780_v19, %v758_v41 }
 0x15b   :  { %v893_v61 = vadd.f32 %v892_v46, %v734_v42 }
 0x15c   :  { %v804_v51 = vadd.f32 %v803_v37, %v781_v47 }
 0x161   :  { %v823_v4 = vpop.f32.mrf.mxu2  ;;  %v846_v22 = vpop.f32.mrf.mxu1 }
 0x162   :  { %v824_v56 = vadd.f32 %v823_v4, %v801_v45  ;;  %v895_v55 = vpop.f32.mrf.mxu0 }
 0x163   :  { %v896_v6 = vadd.f32 %v895_v55, %v734_v42 }
 0x164   :  { %v847_v49 = vadd.f32 %v846_v22, %v824_v56 }
 0x169   :  { %v826_v26 = vpop.f32.mrf.mxu2  ;;  %v849_v53 = vpop.f32.mrf.mxu1 }
 0x16a   :  { %v827_v54 = vadd.f32 %v826_v26, %v804_v51 }
 0x16c   :  { %v850_v57 = vadd.f32 %v849_v53, %v827_v54 }
 0x170   :  { %v984_v60 = vpop.f32.mrf.mxu0 }
 0x171   :  { %v915_v48 = vpop.f32.mrf.mxu2  ;;  %v938_v3 = vpop.f32.mrf.mxu1 }
 0x172   :  { %v916_v2 = vadd.f32 %v915_v48, %v893_v61 }
 0x174   :  { %v939_v5 = vadd.f32 %v938_v3, %v916_v2 }
 0x177   :  { %v869_v50 = vpop.f32.mrf.mxu3 }
 0x178   :  { %v870_v52 = vadd.f32 %v869_v50, %v847_v49  ;;  %v987_v17 = vpop.f32.mrf.mxu0 }
 0x179   :  { %v918_v58 = vpop.f32.mrf.mxu2  ;;  %v941_v13 = vpop.f32.mrf.mxu1 }
 0x17a   :  { %1013 = vst [vmem:[#allocation10] sm:$0xff] %v870_v52  ;;  %v919_v10 = vadd.f32 %v918_v58, %v896_v6 }
 0x17c   :  { %v942_v14 = vadd.f32 %v941_v13, %v919_v10 }
 0x17f   :  { %v872_v9 = vpop.f32.mrf.mxu3 }
 0x180   :  { %v873_v62 = vadd.f32 %v872_v9, %v850_v57 }
 0x181   :  { %v1007_v8 = vpop.f32.mrf.mxu2 }
 0x182   :  { %1015 = vst [vmem:[#allocation10 + $0x10] sm:$0xff] %v873_v62 }
 0x187   :  { %v961_v1 = vpop.f32.mrf.mxu3 }
 0x188   :  { %v962_v7 = vadd.f32 %v961_v1, %v939_v5 }
 0x189   :  { %v1010_v18 = vpop.f32.mrf.mxu2 }
 0x18a   :  { %v985_v11 = vadd.f32 %v984_v60, %v962_v7 }
 0x18c   :  { %v1008_v12 = vadd.f32 %v1007_v8, %v985_v11 }
 0x18e   :  { %1014 = vst [vmem:[#allocation10 + $0x8] sm:$0xff] %v1008_v12 }
 0x18f   :  { %v964_v15 = vpop.f32.mrf.mxu3 }
 0x190   :  { %v965_v16 = vadd.f32 %v964_v15, %v942_v14 }
 0x192   :  { %v988_v23 = vadd.f32 %v987_v17, %v965_v16 }
 0x194   :  { %v1011_v20 = vadd.f32 %v1010_v18, %v988_v23 }
 0x196   :  { %1016 = vst [vmem:[#allocation10 + $0x18] sm:$0xff] %v1011_v20 }
 0x197   :  { %1029 = dma.vmem_to_hbm [thread:$0]  %s1022_s15, 512, %s1024_s18, [#allocation4], %s1191_s30, %s1191_s30, %s1192_s6  }
 0x198   :  { %1185 = dma.done.wait [#allocation4], 512  }
 0x199   :  { %1186 = vsyncadd [#allocation4], 4294966784 }
 0x19a   :  { %1034 = vsyncpa [#allocation3], 1 }
 0x19b   :  { %1035 = vsyncpa [#allocation6], 1 }
 0x19c   :  { %1036 = vsyncpa [#allocation9], 1 }
 0x19d   :  { %1037 = vsyncpa [#allocation4], 1 }

</bundles_post_ra>
